<compile_context>
chip_gen: v6e
topology: v6e:2x2x1
jax: 0.10.0
libtpu: 0.0.40
codegen_flags: <defaults>
</compile_context>

<pallas_src>
import jax
import jax.numpy as jnp
from jax.experimental import pallas as pl
from jax.experimental.pallas import tpu as pltpu


# --------------------------------------------------------------------------- #
# Kernel
# --------------------------------------------------------------------------- #
def _conv3x3_ps_swish_kernel(x_ref, w_ref, b_ref, o_ref):
    """One (batch, H-tile) step: 3x3 conv + bias + swish + fused PixelShuffle(2).

    x_ref: (1, 1, Ht+2, W+2, Cin)  zero-padded bf16 NHWC input tile (2-row halo)
    w_ref: (3, 3*Cin, 4C)          bf16 taps; row dh holds (dw, cin)-packed rows,
                                   out-channel lanes ordered L = i*2C + j*C + c
    b_ref: (1, 4C)                 f32 bias, same lane ordering
    o_ref: (1, Ht, 2, W, 2C)       output tile; axis 2 is the pixel-shuffle row
                                   parity i (rows interleave to 2h / 2h+1)
    """
    _, Ht, _, W, twoC = o_ref.shape

    x = x_ref[0, 0]                                        # (Ht+2, W+2, Cin)

    # Hoisted dw shifts: the three W-shifted views are built once and packed
    # along the contraction axis -> K = 3*Cin per matmul, i.e. 3 fat MXU
    # matmuls instead of 9 skinny ones.
    xcat = jnp.concatenate(
        [x[:, 0:W, :], x[:, 1:W + 1, :], x[:, 2:W + 2, :]], axis=-1
    )                                                      # (Ht+2, W, 3*Cin)

    dn = (((2,), (0,)), ((), ()))
    # Bias-seeded accumulator: no zeros-init pass and no separate bias-add pass.
    acc = b_ref[0][None, None, :] + jax.lax.dot_general(
        xcat[0:Ht], w_ref[0], dn, preferred_element_type=jnp.float32)
    acc = acc + jax.lax.dot_general(
        xcat[1:1 + Ht], w_ref[1], dn, preferred_element_type=jnp.float32)
    acc = acc + jax.lax.dot_general(
        xcat[2:2 + Ht], w_ref[2], dn, preferred_element_type=jnp.float32)

    acc = acc * jax.nn.sigmoid(acc)                        # swish (EUP)
    y = acc.astype(o_ref.dtype)

    # Fused PixelShuffle: lanes [0:2C] hold parity-i=0 rows, [2C:4C] parity-i=1.
    # At real SRGAN C=64 the split sits exactly on a 128-lane vreg boundary.
    o_ref[0, :, 0] = y[:, :, :twoC]
    o_ref[0, :, 1] = y[:, :, twoC:]


# --------------------------------------------------------------------------- #
# Host-side helpers
# --------------------------------------------------------------------------- #
def _vmem_capacity_bytes():
    try:
        return int(pltpu.get_tpu_info().vmem_capacity_bytes)
    except Exception:
        return 64 * 1024 * 1024        # v7x per-TensorCore worst case


def _footprint_bytes(ht, W, Cin, Cout, out_itemsize):
    """Per-grid-step VMEM footprint estimate for tile height `ht`."""
    in_tile = 2 * (ht + 2) * (W + 2) * Cin * 2        # double-buffered bf16 input
    xcat = (ht + 2) * W * 3 * Cin * 2                 # dw-packed LHS temp (bf16)
    acc = ht * W * Cout * 4                           # f32 accumulator
    out_t = 2 * ht * W * Cout * out_itemsize          # double-buffered output tile
    wts = 3 * 3 * Cin * Cout * 2 + Cout * 4
    return in_tile + xcat + acc + out_t + wts


def _pick_h_tile(H, W, Cin, Cout, out_itemsize, budget_bytes):
    ht_max = 1
    for ht in range(min(H, 64), 0, -1):
        if _footprint_bytes(ht, W, Cin, Cout, out_itemsize) <= budget_bytes:
            ht_max = ht
            break
    # Prefer a waste-free divisor of H when one is reasonably close to ht_max.
    div = max((d for d in range(1, ht_max + 1) if H % d == 0), default=1)
    return div if 2 * div >= ht_max else ht_max


def _pack_params(w_oihw, bias, compute_dtype):
    """PyTorch (Cout, Cin, 3, 3) weights -> pixel-shuffle-fused packed taps."""
    Cout, Cin, KH, KW = w_oihw.shape
    C = Cout // 4
    # PixelShuffle fusion: reorder out-channels  o = c*4 + i*2 + j  ->
    # L = i*2C + j*C + c  (i major, then j, then c).
    w_ps = jnp.transpose(
        w_oihw.reshape(C, 2, 2, Cin, KH, KW), (1, 2, 0, 3, 4, 5)
    ).reshape(Cout, Cin, KH, KW)
    b_ps = jnp.transpose(bias.reshape(C, 2, 2), (1, 2, 0)).reshape(Cout)
    # (kh, kw, cin, cout): per-dh rows ordered (dw, cin), matching xcat layout.
    w_packed = (jnp.transpose(w_ps, (2, 3, 1, 0))
                .reshape(KH, KW * Cin, Cout).astype(compute_dtype))
    b2 = b_ps.reshape(1, Cout).astype(jnp.float32)
    return w_packed, b2


# --------------------------------------------------------------------------- #
# Public entry points
# --------------------------------------------------------------------------- #
def upsample_block_nhwc(x_nhwc, w_oihw, bias, *, h_tile=None,
                        out_dtype=jnp.bfloat16, compute_dtype=jnp.bfloat16):
    """swish(PixelShuffle_2(Conv3x3(x))): NHWC in -> NHWC out (N, 2H, 2W, C)."""
    N, H, W, C = x_nhwc.shape
    Cout = w_oihw.shape[0]
    assert Cout == 4 * C and w_oihw.shape[1] == C and w_oihw.shape[2:] == (3, 3)

    out_itemsize = jnp.dtype(out_dtype).itemsize
    cap = _vmem_capacity_bytes()
    if h_tile is None:
        h_tile = _pick_h_tile(H, W, C, Cout, out_itemsize,
                              budget_bytes=int(0.45 * cap))
    h_tile = max(1, min(int(h_tile), H))
    n_t = -(-H // h_tile)
    Hp = n_t * h_tile                                   # padded H (tail tile ok)

    vmem_limit = int(min(
        0.9 * cap,
        max(32 * 1024 * 1024,
            _footprint_bytes(h_tile, W, C, Cout, out_itemsize) + 8 * 1024 * 1024)))

    # NHWC bf16, zero pad: 1 row/col top/left (conv padding=1) and
    # (Hp - H + 1) rows at the bottom (conv pad + tile-tail pad; the extra zero
    # rows never influence output rows < H, and padded output rows are dropped).
    x = x_nhwc.astype(compute_dtype)
    x_pad = jnp.pad(x, ((0, 0), (1, Hp - H + 1), (1, 1), (0, 0)))
    Wp = W + 2

    # H tiles with a duplicated 2-row halo (overlapping windows are not
    # expressible with Blocked index maps; the duplication only touches the
    # input, which is 4-8x smaller than the output).
    # TODO(synk): replace with a manual-DMA (pl.ANY) input path to drop this
    # pre-pass, and add a W grid axis (2-col halo) for very wide images.
    if n_t == 1:
        x_tiles = x_pad[:, None]
    else:
        x_tiles = jnp.stack(
            [x_pad[:, t * h_tile: t * h_tile + h_tile + 2] for t in range(n_t)],
            axis=1)                                     # (N, n_t, h_tile+2, Wp, C)

    w_packed, b2 = _pack_params(w_oihw, bias, compute_dtype)

    y = pl.pallas_call(
        _conv3x3_ps_swish_kernel,
        out_shape=jax.ShapeDtypeStruct((N, Hp, 2, W, 2 * C), out_dtype),
        grid=(N, n_t),
        in_specs=[
            pl.BlockSpec((1, 1, h_tile + 2, Wp, C), lambda n, t: (n, t, 0, 0, 0)),
            pl.BlockSpec((3, 3 * C, Cout), lambda n, t: (0, 0, 0)),
            pl.BlockSpec((1, Cout), lambda n, t: (0, 0)),
        ],
        out_specs=pl.BlockSpec((1, h_tile, 2, W, 2 * C),
                               lambda n, t: (n, t, 0, 0, 0)),
        compiler_params=pltpu.CompilerParams(
            dimension_semantics=("parallel", "parallel"),
            vmem_limit_bytes=vmem_limit),
    )(x_tiles, w_packed, b2)                            # (N, Hp, 2, W, 2C)

    if Hp != H:
        y = y[:, :H]
    # Pure reshape (no transpose): (N, H, 2, W, 2C) row-major == (N, 2H, 2W, C).
    return y.reshape(N, 2 * H, 2 * W, C)


def upsample_block(x_nchw, w_oihw, bias, *, h_tile=None,
                   out_dtype=jnp.bfloat16, compute_dtype=jnp.bfloat16):
    """PyTorch-parity entry point: NCHW in -> NCHW out (N, C, 2H, 2W).

    Chained TPU use should call upsample_block_nhwc directly and skip both
    layout transposes (the whole op then becomes a single HBM pass).
    """
    x_nhwc = jnp.transpose(x_nchw, (0, 2, 3, 1))
    y = upsample_block_nhwc(x_nhwc, w_oihw, bias, h_tile=h_tile,
                            out_dtype=out_dtype, compute_dtype=compute_dtype)
    return jnp.transpose(y, (0, 3, 1, 2))


# --------------------------------------------------------------------------- #
# Reference & test
# --------------------------------------------------------------------------- #
def _reference(x_nchw, w_oihw, bias):
    """Pure-JAX f32 reference (NCHW conv + pixel shuffle + swish)."""
    y = jax.lax.conv_general_dilated(
        x_nchw, w_oihw, window_strides=(1, 1), padding=((1, 1), (1, 1)),
        dimension_numbers=("NCHW", "OIHW", "NCHW"))
    y = y + bias[None, :, None, None]
    N, Cout, H, W = y.shape
    r = 2
    Cs = Cout // (r * r)
    y = y.reshape(N, Cs, r, r, H, W)
    y = jnp.transpose(y, (0, 1, 4, 2, 5, 3)).reshape(N, Cs, H * r, W * r)
    return y * jax.nn.sigmoid(y)


if __name__ == "__main__":
    key = jax.random.PRNGKey(0)
    k_x, k_w, k_b = jax.random.split(key, 3)

    N, C, H, W = 2, 4, 16, 16
    x = jax.random.normal(k_x, (N, C, H, W), dtype=jnp.float32)
    # Shapes as in nn.Conv2d(C, 4C, kernel_size=3, stride=1, padding=1).
    w = jax.random.normal(k_w, (4 * C, C, 3, 3), dtype=jnp.float32) * 0.1
    b = jax.random.normal(k_b, (4 * C,), dtype=jnp.float32) * 0.1

    fwd = jax.jit(upsample_block,
                  static_argnames=("h_tile", "out_dtype", "compute_dtype"))
    out = jax.block_until_ready(fwd(x, w, b))

    ref = jax.block_until_ready(_reference(x, w, b))
    assert out.shape == (N, C, 2 * H, 2 * W), out.shape
    out_f32 = out.astype(jnp.float32)
    # bf16 matmul operands + bf16 output (f32 accumulation) vs f32 reference.
    err = float(jnp.max(jnp.abs(out_f32 - ref)))
    assert jnp.allclose(out_f32, ref, atol=5e-2, rtol=5e-2), f"max abs err {err}"

    print("KERNEL_OK")
</pallas_src>

<mosaic_0001>
module attributes {stable_mosaic.version = 11 : i64} {
  func.func @_conv3x3_ps_swish_kernel(%arg0: i32, %arg1: i32, %arg2: memref<1x1x18x18x4xbf16, #tpu.memory_space<vmem>>, %arg3: memref<3x12x16xbf16, #tpu.memory_space<vmem>>, %arg4: memref<1x16xf32, #tpu.memory_space<vmem>>, %arg5: memref<1x16x2x16x8xbf16, #tpu.memory_space<vmem>>) attributes {dimension_semantics = [#tpu.dimension_semantics<parallel>, #tpu.dimension_semantics<parallel>], iteration_bounds = array<i64: 2, 1>, scalar_prefetch = 0 : i64, scratch_operands = 0 : i64, tpu.core_type = #tpu.core_type<tc>, window_params = [{transform_indices = @transform_0, window_bounds = array<i64: 1, 1, 18, 18, 4>}, {pipeline_mode = #tpu.pipeline_mode<synchronous>, transform_indices = @transform_1, window_bounds = array<i64: 3, 12, 16>}, {pipeline_mode = #tpu.pipeline_mode<synchronous>, transform_indices = @transform_2, window_bounds = array<i64: 1, 16>}, {transform_indices = @transform_3, window_bounds = array<i64: 1, 16, 2, 16, 8>}]} {
    %c0 = arith.constant 0 : index
    %c0_0 = arith.constant 0 : index
    %c0_1 = arith.constant 0 : index
    %c0_2 = arith.constant 0 : index
    %c0_3 = arith.constant 0 : index
    %0 = vector.load %arg2[%c0, %c0_0, %c0_1, %c0_2, %c0_3] : memref<1x1x18x18x4xbf16, #tpu.memory_space<vmem>>, vector<1x1x18x18x4xbf16>
    %1 = vector.shape_cast %0 : vector<1x1x18x18x4xbf16> to vector<18x18x4xbf16>
    %2 = vector.extract_strided_slice %1 {offsets = [0, 0, 0], sizes = [18, 16, 4], strides = [1, 1, 1]} : vector<18x18x4xbf16> to vector<18x16x4xbf16>
    %3 = vector.extract_strided_slice %1 {offsets = [0, 1, 0], sizes = [18, 16, 4], strides = [1, 1, 1]} : vector<18x18x4xbf16> to vector<18x16x4xbf16>
    %4 = vector.extract_strided_slice %1 {offsets = [0, 2, 0], sizes = [18, 16, 4], strides = [1, 1, 1]} : vector<18x18x4xbf16> to vector<18x16x4xbf16>
    %5 = tpu.concatenate %2, %3, %4 in 2 : vector<18x16x4xbf16>, vector<18x16x4xbf16>, vector<18x16x4xbf16> -> vector<18x16x12xbf16>
    %c0_4 = arith.constant 0 : index
    %c0_5 = arith.constant 0 : index
    %6 = vector.load %arg4[%c0_4, %c0_5] : memref<1x16xf32, #tpu.memory_space<vmem>>, vector<1x16xf32>
    %7 = vector.shape_cast %6 : vector<1x16xf32> to vector<16xf32>
    %8 = vector.shape_cast %7 : vector<16xf32> to vector<1x1x16xf32>
    %9 = vector.extract_strided_slice %5 {offsets = [0, 0, 0], sizes = [16, 16, 12], strides = [1, 1, 1]} : vector<18x16x12xbf16> to vector<16x16x12xbf16>
    %c0_6 = arith.constant 0 : index
    %c0_7 = arith.constant 0 : index
    %c0_8 = arith.constant 0 : index
    %10 = vector.load %arg3[%c0_6, %c0_7, %c0_8] : memref<3x12x16xbf16, #tpu.memory_space<vmem>>, vector<1x12x16xbf16>
    %11 = vector.shape_cast %10 : vector<1x12x16xbf16> to vector<12x16xbf16>
    %cst = arith.constant dense<0.000000e+00> : vector<16x16x16xf32>
    %12 = tpu.matmul %9, %11, %cst {dimension_numbers = #tpu.dot_dimension_numbers<[2], [0], [0, 1], [1], [0, 0, 0, 1, 1, 1], [], []>} : vector<16x16x12xbf16>, vector<12x16xbf16>, vector<16x16x16xf32> -> vector<16x16x16xf32>
    %13 = vector.broadcast %8 : vector<1x1x16xf32> to vector<16x16x16xf32>
    %14 = arith.addf %13, %12 : vector<16x16x16xf32>
    %15 = vector.extract_strided_slice %5 {offsets = [1, 0, 0], sizes = [16, 16, 12], strides = [1, 1, 1]} : vector<18x16x12xbf16> to vector<16x16x12xbf16>
    %c1 = arith.constant 1 : index
    %c0_9 = arith.constant 0 : index
    %c0_10 = arith.constant 0 : index
    %16 = vector.load %arg3[%c1, %c0_9, %c0_10] : memref<3x12x16xbf16, #tpu.memory_space<vmem>>, vector<1x12x16xbf16>
    %17 = vector.shape_cast %16 : vector<1x12x16xbf16> to vector<12x16xbf16>
    %cst_11 = arith.constant dense<0.000000e+00> : vector<16x16x16xf32>
    %18 = tpu.matmul %15, %17, %cst_11 {dimension_numbers = #tpu.dot_dimension_numbers<[2], [0], [0, 1], [1], [0, 0, 0, 1, 1, 1], [], []>} : vector<16x16x12xbf16>, vector<12x16xbf16>, vector<16x16x16xf32> -> vector<16x16x16xf32>
    %19 = arith.addf %14, %18 : vector<16x16x16xf32>
    %20 = vector.extract_strided_slice %5 {offsets = [2, 0, 0], sizes = [16, 16, 12], strides = [1, 1, 1]} : vector<18x16x12xbf16> to vector<16x16x12xbf16>
    %c2 = arith.constant 2 : index
    %c0_12 = arith.constant 0 : index
    %c0_13 = arith.constant 0 : index
    %21 = vector.load %arg3[%c2, %c0_12, %c0_13] : memref<3x12x16xbf16, #tpu.memory_space<vmem>>, vector<1x12x16xbf16>
    %22 = vector.shape_cast %21 : vector<1x12x16xbf16> to vector<12x16xbf16>
    %cst_14 = arith.constant dense<0.000000e+00> : vector<16x16x16xf32>
    %23 = tpu.matmul %20, %22, %cst_14 {dimension_numbers = #tpu.dot_dimension_numbers<[2], [0], [0, 1], [1], [0, 0, 0, 1, 1, 1], [], []>} : vector<16x16x12xbf16>, vector<12x16xbf16>, vector<16x16x16xf32> -> vector<16x16x16xf32>
    %24 = arith.addf %19, %23 : vector<16x16x16xf32>
    %25 = arith.negf %24 : vector<16x16x16xf32>
    %26 = math.exp %25 : vector<16x16x16xf32>
    %cst_15 = arith.constant 1.000000e+00 : f32
    %27 = vector.broadcast %cst_15 : f32 to vector<16x16x16xf32>
    %28 = arith.addf %27, %26 : vector<16x16x16xf32>
    %29 = arith.divf %27, %28 : vector<16x16x16xf32>
    %30 = arith.mulf %24, %29 : vector<16x16x16xf32>
    %31 = arith.truncf %30 : vector<16x16x16xf32> to vector<16x16x16xbf16>
    %32 = vector.extract_strided_slice %31 {offsets = [0, 0, 0], sizes = [16, 16, 8], strides = [1, 1, 1]} : vector<16x16x16xbf16> to vector<16x16x8xbf16>
    %c0_16 = arith.constant 0 : index
    %c0_17 = arith.constant 0 : index
    %c0_18 = arith.constant 0 : index
    %c0_19 = arith.constant 0 : index
    %c0_20 = arith.constant 0 : index
    %33 = vector.load %arg5[%c0_16, %c0_17, %c0_18, %c0_19, %c0_20] : memref<1x16x2x16x8xbf16, #tpu.memory_space<vmem>>, vector<1x16x1x16x8xbf16>
    %34 = vector.shape_cast %33 : vector<1x16x1x16x8xbf16> to vector<16x16x8xbf16>
    %35 = vector.shape_cast %32 : vector<16x16x8xbf16> to vector<1x16x1x16x8xbf16>
    tpu.vector_store %arg5[%c0_16, %c0_17, %c0_18, %c0_19, %c0_20], %35 {strides = array<i32>} : memref<1x16x2x16x8xbf16, #tpu.memory_space<vmem>>, vector<1x16x1x16x8xbf16>,
    %36 = vector.extract_strided_slice %31 {offsets = [0, 0, 8], sizes = [16, 16, 8], strides = [1, 1, 1]} : vector<16x16x16xbf16> to vector<16x16x8xbf16>
    %c0_21 = arith.constant 0 : index
    %c0_22 = arith.constant 0 : index
    %c1_23 = arith.constant 1 : index
    %c0_24 = arith.constant 0 : index
    %c0_25 = arith.constant 0 : index
    %37 = vector.load %arg5[%c0_21, %c0_22, %c1_23, %c0_24, %c0_25] : memref<1x16x2x16x8xbf16, #tpu.memory_space<vmem>>, vector<1x16x1x16x8xbf16>
    %38 = vector.shape_cast %37 : vector<1x16x1x16x8xbf16> to vector<16x16x8xbf16>
    %39 = vector.shape_cast %36 : vector<16x16x8xbf16> to vector<1x16x1x16x8xbf16>
    tpu.vector_store %arg5[%c0_21, %c0_22, %c1_23, %c0_24, %c0_25], %39 {strides = array<i32>} : memref<1x16x2x16x8xbf16, #tpu.memory_space<vmem>>, vector<1x16x1x16x8xbf16>,
    return
  }
  func.func @transform_0(%arg0: i32, %arg1: i32) -> (i32, i32, i32, i32, i32) {
    %c0_i32 = arith.constant 0 : i32
    %c0_i32_0 = arith.constant 0 : i32
    %c0_i32_1 = arith.constant 0 : i32
    %c0_i32_2 = arith.constant 0 : i32
    return %arg0, %arg1, %c0_i32, %c0_i32_0, %c0_i32_1 : i32, i32, i32, i32, i32
  }
  func.func @transform_1(%arg0: i32, %arg1: i32) -> (i32, i32, i32) {
    %c0_i32 = arith.constant 0 : i32
    %c0_i32_0 = arith.constant 0 : i32
    %c0_i32_1 = arith.constant 0 : i32
    %c0_i32_2 = arith.constant 0 : i32
    return %c0_i32, %c0_i32_0, %c0_i32_1 : i32, i32, i32
  }
  func.func @transform_2(%arg0: i32, %arg1: i32) -> (i32, i32) {
    %c0_i32 = arith.constant 0 : i32
    %c0_i32_0 = arith.constant 0 : i32
    %c0_i32_1 = arith.constant 0 : i32
    return %c0_i32, %c0_i32_0 : i32, i32
  }
  func.func @transform_3(%arg0: i32, %arg1: i32) -> (i32, i32, i32, i32, i32) {
    %c0_i32 = arith.constant 0 : i32
    %c0_i32_0 = arith.constant 0 : i32
    %c0_i32_1 = arith.constant 0 : i32
    %c0_i32_2 = arith.constant 0 : i32
    return %arg0, %arg1, %c0_i32, %c0_i32_0, %c0_i32_1 : i32, i32, i32, i32, i32
  }
}

</mosaic_0001>

<bundles_post_ra>
// kernel: upsample_block.1
= control target key start
LH: loop header
LB: loop body
LE: loop exit
PB: predicated region body
PF: predicated region fallthrough
CT: control target
= control target key end

     0   :  { %s2725_s12 = smov 0   ;;  %s2727_s13 = smov 0   ;;  %s3588_s0 = inlined_call_operand.vmem [shape: bf16[2,1,18,18,4], index: 0, kind: input, shape index: {}]   ;;  %s3589_s1 = inlined_call_operand.vmem [shape: bf16[3,12,16], index: 1, kind: input, shape index: {}]   ;;  %s3590_s2 = inlined_call_operand.vmem [shape: f32[1,16], index: 2, kind: input, shape index: {}]   ;;  %s3591_s3 = inlined_call_operand.vmem [shape: bf16[2,16,2,16,8], index: 3, kind: output, shape index: {}]  }
   0x1   :  { %s2729_s14 = smov 0  }
   0x2 LB: > { %s25_s15 = sadd.s32 1, %s2696_s13  ;;  %p2097_p0 = scmp.ge.s32.totalorder %s2700_s14, 1  ;;  %s2700_s14 = sphi %s2729_s14, %s13_s14   ;;  %s2696_s13 = sphi %s2727_s13, %s3593_s13   ;;  %s2692_s12 = sphi %s2725_s12, %s3592_s12  }
   0x3   : > { %p27_p1 = scmp.ge.s32.totalorder %s25_s15, 2  ;;  %p157_p2 = scmp.lt.s32.totalorder %s2700_s14, 3 }
   0x5   : > { %s3595_s15 = smov (%p27_p1, %s25_s15), 0  ;;  %p158_p3 = pnand %p2097_p0, %p157_p2 }
   0x6   : > { %p190_p4 = scmp.lt.s32.totalorder (!%p158_p3), %s2692_s12, 1  ;;  %s2702_s20 = smov (!%p158_p3), 8  }
   0x7   : > { %161 = sbr.rel (%p158_p3) target bundleno = 619 (0x26b), region = 32  ;;  %s2703_s21 = smov (!%p158_p3), 4  }
   0x8   : > { %s2704_s7 = smov (!%p158_p3), 120  }
   0xc   : > { %s3597_s12 = smov (!%p190_p4, %s2692_s12), 1  ;;  %vm662_vm0 = vcmask 1046528   ;;  %vm409_vm1 = vsmask.f32 7424  ;;  %vm868_vm2 = vcmask 1045504   ;;  %vm753_vm3 = vcmask 31744  }
   0xd   : > { %s2483_s16 = smul.u32 216, %s3597_s12  ;;  %vm790_vm4 = vcmask 64512   ;;  %vm835_vm5 = vcmask 97280   ;;  %vm1835_vm6 = vcmask 60416   ;;  %s2291_s30 = sshll.u32 %s3597_s12, 8 }
   0xe   : > { %s3321_s6 = scalar_lea.vmem %s3591_s3, %s2291_s30 }
   0xf   : > { %s2749_s19 = scalar_lea.vmem %s3588_s0, %s2483_s16 }
  0x10   : > { %v2752_v0 = vld [vmem:[%s2749_s19 + $0x6c] sm:$0xff]   ;;  %v2512_v1 = vld [vmem:[%s2749_s19 + $0x74] ss:$0 sps:$4 sm:$0x11]   ;;  %v2756_v2 = vld [vmem:[%s2749_s19 + $0x60] sm:$0xff]  }
  0x11   : > { %v690_v3 = vrot.slane %v2752_v0, 1  ;;  %v691_v4 = vrot.slane %v2512_v1, 1  ;;  %v2514_v5 = vld [vmem:[%s2749_s19 + $0x68] ss:$0 sps:$4 sm:$0x11]   ;;  %v2761_v6 = vld [vmem:[%s2749_s19 + $0xc] sm:$0xff]  }
  0x12   : > { %v687_v7 = vrot.slane %v2756_v2, 1  ;;  %v2765_v8 = vld [vmem:[%s2749_s19] sm:$0xff]   ;;  %v688_v10 = vrot.slane %v2514_v5, 1  ;;  %v2516_v11 = vld [vmem:[%s2749_s19 + $0x14] ss:$0 sps:$4 sm:$0x11]  }
  0x13   : > { %v692_v9 = vsel %vm662_vm0, %v690_v3, %v691_v4  ;;  %v666_v12 = vrot.slane %v2761_v6, 1  ;;  %v663_v13 = vrot.slane %v2765_v8, 1  ;;  %v667_v15 = vrot.slane %v2516_v11, 1  ;;  %v2518_v16 = vld [vmem:[%s2749_s19 + $0x8] ss:$0 sps:$4 sm:$0x11]  }
  0x14   : > { %735 = vrot.lane.b32.xlu0 %v692_v9, %s2702_s20  ;;  %v689_v14 = vsel %vm662_vm0, %v687_v7, %v688_v10  ;;  %v507_v17 = vshrl.u32 %v2756_v2, 16  ;;  %v509_v18 = vshll.u32 %v2756_v2, 16  ;;  %v514_v19 = vshll.u32 %v2514_v5, 16  ;;  %v2781_v25 = vld [vmem:[%s2749_s19 + $0x78] sm:$0xff]   ;;  %v2794_v39 = vld [vmem:[%s2749_s19 + $0x84] sm:$0xff]   ;;  %v2820_v10 = vld [vmem:[%s2749_s19 + $0x90] sm:$0xff]  }
  0x15   : > { %733 = vrot.lane.b32.xlu1 %v689_v14, %s2702_s20  ;;  %v411_v20 = vshrl.u32 %v2765_v8, 16  ;;  %v668_v21 = vsel %vm662_vm0, %v666_v12, %v667_v15  ;;  %v664_v22 = vrot.slane %v2518_v16, 1  ;;  %v413_v23 = vshll.u32 %v2765_v8, 16  ;;  %v2787_v34 = vld [vmem:[%s2749_s19 + $0x80] ss:$0 sps:$4 sm:$0x11]  }
  0x16   : > { %v418_v24 = vshll.u32 %v2518_v16, 16  ;;  %v511_v26 = vrot.slane %v509_v18, 1  ;;  %v516_v27 = vrot.slane %v514_v19, 1  ;;  %v519_v28 = vshrl.u32 %v2752_v0, 16  ;;  %v2798_v44 = vld [vmem:[%s2749_s19 + $0x18] sm:$0xff]   ;;  %v2815_v4 = vld [vmem:[%s2749_s19 + $0x24] sm:$0xff]  }
  0x17   : > { %v521_v29 = vshll.u32 %v2752_v0, 16  ;;  %v665_v30 = vsel %vm662_vm0, %v663_v13, %v664_v22  ;;  %v415_v31 = vrot.slane %v413_v23, 1  ;;  %v526_v33 = vshll.u32 %v2512_v1, 16  ;;  %v2522_v52 = vld [vmem:[%s2749_s19 + $0x8c] ss:$0 sps:$4 sm:$0x11]  }
  0x18   : > { %v420_v32 = vrot.slane %v418_v24, 1  ;;  %717 = vrot.lane.b32.xlu0 %v665_v30, %s2702_s20  ;;  %v512_v35 = vor.u32 %v511_v26, %v507_v17  ;;  %v423_v37 = vshrl.u32 %v2761_v6, 16  ;;  %v425_v38 = vshll.u32 %v2761_v6, 16  ;;  %v2524_v3 = vld [vmem:[%s2749_s19 + $0x20] ss:$0 sps:$4 sm:$0x11]  }
  0x19   : > { %719 = vrot.lane.b32.xlu1 %v668_v21, %s2702_s20  ;;  %v523_v36 = vrot.slane %v521_v29, 1  ;;  %v416_v40 = vor.u32 %v415_v31, %v411_v20  ;;  %v528_v41 = vrot.slane %v526_v33, 1  ;;  %v430_v42 = vshll.u32 %v2516_v11, 16  ;;  %v2526_v16 = vld [vmem:[%s2749_s19 + $0x2c] ss:$0 sps:$4 sm:$0x11]  }
  0x1a   : > { %v531_v43 = vshrl.u32 %v2781_v25, 16  ;;  %v517_v45 = vsel %vm409_vm1, %v512_v35, %v516_v27  ;;  %v427_v47 = vrot.slane %v425_v38, 1  ;;  %v533_v48 = vshll.u32 %v2781_v25, 16  ;;  %v2528_v27 = vld [vmem:[%s2749_s19 + $0x98] ss:$0 sps:$4 sm:$0x11]  }
  0x1b   : > { %v524_v46 = vor.u32 %v523_v36, %v519_v28  ;;  %v421_v49 = vsel %vm409_vm1, %v416_v40, %v420_v32  ;;  %v432_v50 = vrot.slane %v430_v42, 1  ;;  %v538_v51 = vshll.u32 %v2787_v34, 16  ;;  %v2838_v33 = vld [vmem:[%s2749_s19 + $0x9c] sm:$0xff]   ;;  %v2847_v42 = vld [vmem:[%s2749_s19 + $0x30] sm:$0xff]  }
  0x1c   : > { %v543_v53 = vshrl.u32 %v2794_v39, 16  ;;  %642 = vrot.lane.b32.xlu0 %v517_v45, %s2703_s21  ;;  %v428_v54 = vor.u32 %v427_v47, %v423_v37  ;;  %v535_v55 = vrot.slane %v533_v48, 1  ;;  %v545_v56 = vshll.u32 %v2794_v39, 16  ;;  %v2842_v37 = vld [vmem:[%s2749_s19 + $0xa4] ss:$0 sps:$4 sm:$0x11]  }
  0x1d   : > { %626 = vrot.lane.b32.xlu1 %v421_v49, %s2703_s21  ;;  %v529_v57 = vsel %vm409_vm1, %v524_v46, %v528_v41  ;;  %v540_v58 = vrot.slane %v538_v51, 1  ;;  %v550_v59 = vshll.u32 %v2522_v52, 16  ;;  %v693_v60 = vrot.slane %v2781_v25, 1 }
  0x1e   : > { %v433_v61 = vsel %vm409_vm1, %v428_v54, %v432_v50  ;;  %v536_v62 = vor.u32 %v535_v55, %v531_v43  ;;  %v547_v63 = vrot.slane %v545_v56, 1  ;;  %v694_v1 = vrot.slane %v2787_v34, 1  ;;  %v2856_v50 = vld [vmem:[%s2749_s19 + $0x38] ss:$0 sps:$4 sm:$0x11]  }
  0x1f   : > { %v552_v5 = vrot.slane %v550_v59, 1  ;;  %v435_v7 = vshrl.u32 %v2798_v44, 16  ;;  %v437_v9 = vshll.u32 %v2798_v44, 16  ;;  %v442_v12 = vshll.u32 %v2524_v3, 16 }
  0x20   : > { %644 = vrot.lane.b32.xlu0 %v529_v57, %s2703_s21  ;;  %v548_v11 = vor.u32 %v547_v63, %v543_v53  ;;  %v696_v13 = vrot.slane %v2794_v39, 1  ;;  %v541_v14 = vsel %vm409_vm1, %v536_v62, %v540_v58  ;;  %v447_v17 = vshrl.u32 %v2815_v4, 16  ;;  %v2869_v58 = vld [vmem:[%s2749_s19 + $0x44] ss:$0 sps:$4 sm:$0x11]  }
  0x21   : > { %628 = vrot.lane.b32.xlu1 %v433_v61, %s2703_s21  ;;  %v439_v15 = vrot.slane %v437_v9, 1  ;;  %v449_v18 = vshll.u32 %v2815_v4, 16  ;;  %v444_v20 = vrot.slane %v442_v12, 1  ;;  %v697_v21 = vrot.slane %v2522_v52, 1  ;;  %v2860_v52 = vld [vmem:[%s2749_s19 + $0x3c] sm:$0xff]  }
  0x22   : > { %v553_v19 = vsel %vm409_vm1, %v548_v11, %v552_v5  ;;  %v454_v24 = vshll.u32 %v2526_v16, 16  ;;  %v669_v26 = vrot.slane %v2798_v44, 1  ;;  %v557_v28 = vshll.u32 %v2820_v10, 16 }
  0x23   : > { %v440_v22 = vor.u32 %v439_v15, %v435_v7  ;;  %v451_v23 = vrot.slane %v449_v18, 1  ;;  %v695_v29 = vsel %vm662_vm0, %v693_v60, %v694_v1  ;;  %v670_v34 = vrot.slane %v2524_v3, 1  ;;  %v2875_v7 = vld [vmem:[%s2749_s19 + $0xa8] sm:$0xff]   ;;  %v2887_v18 = vld [vmem:[%s2749_s19 + $0xb4] sm:$0xff]  }
  0x24   : > { %646 = vrot.lane.b32.xlu0 %v541_v14, %s2703_s21  ;;  %v456_v32 = vrot.slane %v454_v24, 1  ;;  %v672_v35 = vrot.slane %v2815_v4, 1  ;;  %v673_v36 = vrot.slane %v2526_v16, 1  ;;  %v555_v38 = vshrl.u32 %v2820_v10, 16 }
  0x25   : > { %648 = vrot.lane.b32.xlu1 %v553_v19, %s2703_s21  ;;  %v445_v30 = vsel %vm409_vm1, %v440_v22, %v444_v20  ;;  %v452_v31 = vor.u32 %v451_v23, %v447_v17  ;;  %v559_v40 = vrot.slane %v557_v28, 1  ;;  %v569_v41 = vshll.u32 %v2838_v33, 16  ;;  %v2883_v16 = vld [vmem:[%s2749_s19 + $0xb0] ss:$0 sps:$4 sm:$0x11]  }
  0x26   : > { %v698_v43 = vsel %vm662_vm0, %v696_v13, %v697_v21  ;;  %v562_v45 = vshll.u32 %v2528_v27, 16  ;;  %v567_v46 = vshrl.u32 %v2838_v33, 16  ;;  %v574_v49 = vshll.u32 %v2842_v37, 16  ;;  %v2890_v19 = vld [vmem:[%s2749_s19 + $0xbc] ss:$0 sps:$4 sm:$0x11]  }
  0x27   : > { %v457_v47 = vsel %vm409_vm1, %v452_v31, %v456_v32  ;;  %v571_v48 = vrot.slane %v569_v41, 1  ;;  %v461_v51 = vshll.u32 %v2847_v42, 16  ;;  %v671_v53 = vsel %vm662_vm0, %v669_v26, %v670_v34  ;;  %v2906_v34 = vld [vmem:[%s2749_s19 + $0x50] ss:$0 sps:$4 sm:$0x11]  }
  0x28   : > { %737 = vrot.lane.b32.xlu0 %v695_v29, %s2702_s20  ;;  %v459_v54 = vshrl.u32 %v2847_v42, 16  ;;  %v674_v55 = vsel %vm662_vm0, %v672_v35, %v673_v36  ;;  %v466_v57 = vshll.u32 %v2856_v50, 16  ;;  %v473_v59 = vshll.u32 %v2860_v52, 16 }
  0x29   : > { %630 = vrot.lane.b32.xlu1 %v445_v30, %s2703_s21  ;;  %v463_v56 = vrot.slane %v461_v51, 1  ;;  %v560_v60 = vor.u32 %v559_v40, %v555_v38  ;;  %v564_v61 = vrot.slane %v562_v45, 1  ;;  %v572_v62 = vor.u32 %v571_v48, %v567_v46  ;;  %v2919_v48 = vld [vmem:[%s2749_s19 + $0x54] sm:$0xff]  }
  0x2a   : > { %v576_v63 = vrot.slane %v574_v49, 1  ;;  %v699_v1 = vrot.slane %v2820_v10, 1  ;;  %v700_v3 = vrot.slane %v2528_v27, 1  ;;  %v471_v5 = vshrl.u32 %v2860_v52, 16  ;;  %v2900_v27 = vld [vmem:[%s2749_s19 + $0x48] sm:$0xff]  }
  0x2b   : > { %v464_v9 = vor.u32 %v463_v56, %v459_v54  ;;  %v468_v11 = vrot.slane %v466_v57, 1  ;;  %v475_v12 = vrot.slane %v473_v59, 1  ;;  %v565_v13 = vsel %vm409_vm1, %v560_v60, %v564_v61  ;;  %v2924_v54 = vld [vmem:[%s2749_s19 + $0xc0] sm:$0xff]   ;;  %v2927_v56 = vld [vmem:[%s2749_s19 + $0x5c] ss:$0 sps:$4 sm:$0x11]  }
  0x2c   : > { %739 = vrot.lane.b32.xlu0 %v698_v43, %s2702_s20  ;;  %v577_v14 = vsel %vm409_vm1, %v572_v62, %v576_v63  ;;  %v478_v15 = vshll.u32 %v2869_v58, 16  ;;  %v581_v17 = vshll.u32 %v2875_v7, 16  ;;  %v701_v20 = vsel %vm662_vm0, %v699_v1, %v700_v3  ;;  %v2930_v57 = vld [vmem:[%s2749_s19 + $0xc8] ss:$0 sps:$4 sm:$0x11]  }
  0x2d   : > { %632 = vrot.lane.b32.xlu1 %v457_v47, %s2703_s21  ;;  %v593_v21 = vshll.u32 %v2887_v18, 16  ;;  %v469_v22 = vsel %vm409_vm1, %v464_v9, %v468_v11  ;;  %v702_v23 = vrot.slane %v2838_v33, 1  ;;  %v703_v24 = vrot.slane %v2842_v37, 1  ;;  %v2547_v1 = vld [vmem:[%s3589_s1] sm:$0x3f]   ;;  %v2946_v11 = vld [vmem:[%s2749_s19 + $0xcc] sm:$0xff]  }
  0x2e   : > { %v476_v26 = vor.u32 %v475_v12, %v471_v5  ;;  %v480_v28 = vrot.slane %v478_v15, 1  ;;  %v579_v29 = vshrl.u32 %v2875_v7, 16  ;;  %v583_v30 = vrot.slane %v581_v17, 1  ;;  %v2546_v12 = vld [vmem:[%s2749_s19 + $0xd4] ss:$0 sps:$4 sm:$0x11]   ;;  %2479 = vmatprep.subr.msk.bf16.mxu0 %vm868_vm2, %v2547_v1  ;;  %2480 = vmatprep.subr.msk.bf16.mxu1 %vm868_vm2, %v2547_v1 }
  0x2f   : > { %v586_v31 = vshll.u32 %v2883_v16, 16  ;;  %v598_v32 = vshll.u32 %v2890_v19, 16  ;;  %v675_v35 = vrot.slane %v2847_v42, 1  ;;  %v676_v36 = vrot.slane %v2856_v50, 1 }
  0x30   : > { %721 = vrot.lane.b32.xlu0 %v671_v53, %s2702_s20  ;;  %v591_v37 = vshrl.u32 %v2887_v18, 16  ;;  %v595_v38 = vrot.slane %v593_v21, 1  ;;  %v678_v40 = vrot.slane %v2860_v52, 1  ;;  %v679_v41 = vrot.slane %v2869_v58, 1 }
  0x31   : > { %723 = vrot.lane.b32.xlu1 %v674_v55, %s2702_s20  ;;  %v485_v43 = vshll.u32 %v2900_v27, 16  ;;  %v704_v45 = vsel %vm662_vm0, %v702_v23, %v703_v24  ;;  %v481_v46 = vsel %vm409_vm1, %v476_v26, %v480_v28  ;;  %v588_v47 = vrot.slane %v586_v31, 1 }
  0x32   : > { %v584_v49 = vor.u32 %v583_v30, %v579_v29  ;;  %v600_v50 = vrot.slane %v598_v32, 1  ;;  %v483_v51 = vshrl.u32 %v2900_v27, 16  ;;  %v490_v53 = vshll.u32 %v2906_v34, 16 }
  0x33   : > { %v596_v55 = vor.u32 %v595_v38, %v591_v37  ;;  %v487_v58 = vrot.slane %v485_v43, 1  ;;  %v711_v59 = vrot.slane %v2924_v54, 1  ;;  %v677_v60 = vsel %vm662_vm0, %v675_v35, %v676_v36 }
  0x34   : > { %650 = vrot.lane.b32.xlu0 %v565_v13, %s2703_s21  ;;  %v680_v61 = vsel %vm662_vm0, %v678_v40, %v679_v41  ;;  %v497_v62 = vshll.u32 %v2919_v48, 16  ;;  %v712_v63 = vrot.slane %v2930_v57, 1  ;;  %v589_v3 = vsel %vm409_vm1, %v584_v49, %v588_v47 }
  0x35   : > { %652 = vrot.lane.b32.xlu1 %v577_v14, %s2703_s21  ;;  %v705_v5 = vrot.slane %v2875_v7, 1  ;;  %v706_v9 = vrot.slane %v2883_v16, 1  ;;  %v601_v13 = vsel %vm409_vm1, %v596_v55, %v600_v50  ;;  %v492_v14 = vrot.slane %v490_v53, 1  ;;  %v2549_v16 = vld [vmem:[%s3589_s1 + $0x10] sm:$0x3f]  }
  0x36   : > { %v495_v15 = vshrl.u32 %v2919_v48, 16  ;;  %v713_v17 = vsel %vm662_vm0, %v711_v59, %v712_v63  ;;  %v488_v21 = vor.u32 %v487_v58, %v483_v51  ;;  %v714_v23 = vrot.slane %v2946_v11, 1 }
  0x37   : > { %v715_v24 = vrot.slane %v2546_v12, 1  ;;  %v499_v26 = vrot.slane %v497_v62, 1  ;;  %v870_v28 = vsel %vm868_vm2, %v2547_v1, 0  ;;  %v2969_v30 = vsel %vm868_vm2, %v2549_v16, 0 }
  0x38   : > { %741 = vrot.lane.b32.xlu0 %v701_v20, %s2702_s20  ;;  %v2548_v20 = vld [vmem:[%s3589_s1 + $0x8] sm:$0x3f]   ;;  %2376 = vmatpush3.bf16.msra.mxu0 %v870_v28  ;;  %v707_v32 = vsel %vm662_vm0, %v705_v5, %v706_v9  ;;  %v708_v35 = vrot.slane %v2887_v18, 1  ;;  %v605_v36 = vshll.u32 %v2924_v54, 16  ;;  %v493_v37 = vsel %vm409_vm1, %v488_v21, %v492_v14 }
  0x39   : > { %634 = vrot.lane.b32.xlu1 %v469_v22, %s2703_s21  ;;  %v502_v22 = vshll.u32 %v2927_v56, 16  ;;  %v2966_v29 = vsel %vm868_vm2, %v2548_v20, 0  ;;  %v716_v31 = vsel %vm662_vm0, %v714_v23, %v715_v24  ;;  %2478 = vmatpush3.bf16.msra.mxu1 %v870_v28  ;;  %v709_v38 = vrot.slane %v2890_v19, 1 }
  0x3a   : > { %2481 = vmatprep.subr.msk.bf16.mxu1 %vm868_vm2, %v2548_v20  ;;  %2482 = vmatprep.subr.msk.bf16.mxu0 %vm868_vm2, %v2549_v16  ;;  %v500_v40 = vor.u32 %v499_v26, %v495_v15  ;;  %v681_v43 = vrot.slane %v2900_v27, 1  ;;  %v685_v47 = vrot.slane %v2927_v56, 1  ;;  %v603_v49 = vshrl.u32 %v2924_v54, 16 }
  0x3b   : > { %v504_v41 = vrot.slane %v502_v22, 1  ;;  %v607_v50 = vrot.slane %v605_v36, 1  ;;  %v710_v51 = vsel %vm662_vm0, %v708_v35, %v709_v38  ;;  %v610_v53 = vshll.u32 %v2930_v57, 16 }
  0x3c   : > { %743 = vrot.lane.b32.xlu0 %v704_v45, %s2702_s20  ;;  %v682_v45 = vrot.slane %v2906_v34, 1  ;;  %v617_v55 = vshll.u32 %v2946_v11, 16  ;;  %v622_v62 = vshll.u32 %v2546_v12, 16 }
  0x3d   : > { %636 = vrot.lane.b32.xlu1 %v481_v46, %s2703_s21  ;;  %v684_v46 = vrot.slane %v2919_v48, 1  ;;  %v505_v19 = vsel %vm409_vm1, %v500_v40, %v504_v41  ;;  %v608_v56 = vor.u32 %v607_v50, %v603_v49  ;;  %v612_v59 = vrot.slane %v610_v53, 1 }
  0x3e   : > { %v683_v34 = vsel %vm662_vm0, %v681_v43, %v682_v45  ;;  %v624_v1 = vrot.slane %v622_v62, 1 }
  0x3f   : > { %v686_v58 = vsel %vm662_vm0, %v684_v46, %v685_v47  ;;  %v613_v57 = vsel %vm409_vm1, %v608_v56, %v612_v59 }
  0x40   : > { %725 = vrot.lane.b32.xlu0 %v677_v60, %s2702_s20  ;;  %v615_v60 = vshrl.u32 %v2946_v11, 16 }
  0x41   : > { %727 = vrot.lane.b32.xlu1 %v680_v61, %s2702_s20  ;;  %v619_v61 = vrot.slane %v617_v55, 1 }
  0x43   : > { %v620_v63 = vor.u32 %v619_v61, %v615_v60 }
  0x44   : > { %654 = vrot.lane.b32.xlu0 %v589_v3, %s2703_s21 }
  0x45   : > { %656 = vrot.lane.b32.xlu1 %v601_v13, %s2703_s21  ;;  %v625_v3 = vsel %vm409_vm1, %v620_v63, %v624_v1 }
  0x48   : > { %745 = vrot.lane.b32.xlu0 %v707_v32, %s2702_s20 }
  0x49   : > { %638 = vrot.lane.b32.xlu1 %v493_v37, %s2703_s21 }
  0x4c   : > { %747 = vrot.lane.b32.xlu0 %v710_v51, %s2702_s20 }
  0x4d   : > { %640 = vrot.lane.b32.xlu1 %v505_v19, %s2703_s21 }
  0x50   : > { %729 = vrot.lane.b32.xlu0 %v683_v34, %s2702_s20 }
  0x51   : > { %731 = vrot.lane.b32.xlu1 %v686_v58, %s2702_s20 }
  0x54   : > { %658 = vrot.lane.b32.xlu0 %v613_v57, %s2703_s21 }
  0x55   : > { %749 = vrot.lane.b32.xlu1 %v713_v17, %s2702_s20 }
  0x58   : > { %660 = vrot.lane.b32.xlu0 %v625_v3, %s2703_s21 }
  0x59   : > { %751 = vrot.lane.b32.xlu1 %v716_v31, %s2702_s20 }
  0x86   : > { %v736_v5 = vpop.permute.xlu0 %735 }
  0x87   : > { %v734_v9 = vpop.permute.xlu1 %733 }
  0x8a   : > { %v718_v13 = vpop.permute.xlu0 %717 }
  0x8b   : > { %v720_v12 = vpop.permute.xlu1 %719 }
  0x8e   : > { %v643_v14 = vpop.permute.xlu0 %642 }
  0x8f   : > { %v627_v15 = vpop.permute.xlu1 %626  ;;  %v771_v20 = vsel %vm753_vm3, %v2756_v2, %v643_v14 }
  0x90   : > { %v755_v17 = vsel %vm753_vm3, %v2765_v8, %v627_v15  ;;  %v3010_v16 = vsel %vm790_vm4, %v771_v20, %v734_v9 }
  0x91   : > { %v792_v21 = vsel %vm790_vm4, %v755_v17, %v718_v13  ;;  %2393 = vmatprep.mubr.msk.bf16.mxu1 %vm835_vm5, %v3010_v16 }
  0x92   : > { %2377 = vmatprep.mubr.msk.bf16.mxu0 %vm835_vm5, %v792_v21  ;;  %v645_v22 = vpop.permute.xlu0 %644 }
  0x93   : > { %v629_v23 = vpop.permute.xlu1 %628  ;;  %v773_v24 = vsel %vm753_vm3, %v2752_v0, %v645_v22 }
  0x94   : > { %v757_v2 = vsel %vm753_vm3, %v2761_v6, %v629_v23  ;;  %v3022_v26 = vsel %vm790_vm4, %v773_v24, %v736_v5 }
  0x95   : > { %v794_v8 = vsel %vm790_vm4, %v757_v2, %v720_v12  ;;  %2394 = vmatmul.mubr.msk.bf16.vlgmr.msra.gmra.mxu1 %vm835_vm5, %v3022_v26 }
  0x96   : > { %2378 = vmatmul.mubr.msk.bf16.vlgmr.msra.gmra.mxu0 %vm835_vm5, %v794_v8  ;;  %v647_v28 = vpop.permute.xlu0 %646  ;;  %2410 = vmatpush3.bf16.msra.mxu1 %v2966_v29 }
  0x97   : > { %v649_v31 = vpop.permute.xlu1 %648  ;;  %2444 = vmatpush3.bf16.msra.mxu0 %v2969_v30  ;;  %v775_v0 = vsel %vm753_vm3, %v2781_v25, %v647_v28 }
  0x98   : > { %v777_v36 = vsel %vm753_vm3, %v2794_v39, %v649_v31 }
  0x9a   : > { %v738_v6 = vpop.permute.xlu0 %737 }
  0x9b   : > { %v631_v32 = vpop.permute.xlu1 %630  ;;  %v3032_v35 = vsel %vm790_vm4, %v775_v0, %v738_v6 }
  0x9c   : > { %2397 = vmatprep.mubr.msk.bf16.mxu1 %vm835_vm5, %v3032_v35  ;;  %v759_v25 = vsel %vm753_vm3, %v2798_v44, %v631_v32 }
  0x9e   : > { %v740_v37 = vpop.permute.xlu0 %739 }
  0x9f   : > { %v633_v38 = vpop.permute.xlu1 %632  ;;  %v3039_v29 = vsel %vm790_vm4, %v777_v36, %v740_v37 }
  0xa0   : > { %2398 = vmatmul.mubr.msk.bf16.gmra.mxu1 %vm835_vm5, %v3039_v29  ;;  %v761_v30 = vsel %vm753_vm3, %v2815_v4, %v633_v38 }
  0xa2   : > { %v722_v40 = vpop.permute.xlu0 %721 }
  0xa3   : > { %v724_v41 = vpop.permute.xlu1 %723  ;;  %v796_v43 = vsel %vm790_vm4, %v759_v25, %v722_v40 }
  0xa4   : > { %v798_v39 = vsel %vm790_vm4, %v761_v30, %v724_v41  ;;  %2381 = vmatprep.mubr.msk.bf16.mxu0 %vm835_vm5, %v796_v43 }
  0xa5   : > { %2382 = vmatmul.mubr.msk.bf16.gmra.mxu0 %vm835_vm5, %v798_v39 }
  0xa6   : > { %v651_v45 = vpop.permute.xlu0 %650 }
  0xa7   : > { %v653_v46 = vpop.permute.xlu1 %652  ;;  %v779_v47 = vsel %vm753_vm3, %v2820_v10, %v651_v45 }
  0xa8   : > { %v781_v4 = vsel %vm753_vm3, %v2838_v33, %v653_v46 }
  0xaa   : > { %v742_v49 = vpop.permute.xlu0 %741 }
  0xab   : > { %v635_v44 = vpop.permute.xlu1 %634  ;;  %v3054_v50 = vsel %vm790_vm4, %v779_v47, %v742_v49 }
  0xac   : > { %2401 = vmatprep.mubr.msk.bf16.mxu1 %vm835_vm5, %v3054_v50  ;;  %v763_v10 = vsel %vm753_vm3, %v2847_v42, %v635_v44 }
  0xae   : > { %v744_v51 = vpop.permute.xlu0 %743 }
  0xaf   : > { %v637_v19 = vpop.permute.xlu1 %636  ;;  %v818_v53 = vsel %vm790_vm4, %v781_v4, %v744_v51 }
  0xb0   : > { %2402 = vmatmul.mubr.msk.bf16.gmra.mxu1 %vm835_vm5, %v818_v53  ;;  %v765_v55 = vsel %vm753_vm3, %v2860_v52, %v637_v19 }
  0xb2   : > { %v726_v34 = vpop.permute.xlu0 %725 }
  0xb3   : > { %v728_v58 = vpop.permute.xlu1 %727  ;;  %v800_v56 = vsel %vm790_vm4, %v763_v10, %v726_v34 }
  0xb4   : > { %v802_v59 = vsel %vm790_vm4, %v765_v55, %v728_v58  ;;  %2385 = vmatprep.mubr.msk.bf16.mxu0 %vm835_vm5, %v800_v56 }
  0xb5   : > { %2386 = vmatmul.mubr.msk.bf16.gmra.mxu0 %vm835_vm5, %v802_v59 }
  0xb6   : > { %v655_v33 = vpop.permute.xlu0 %654 }
  0xb7   : > { %v657_v60 = vpop.permute.xlu1 %656  ;;  %v783_v61 = vsel %vm753_vm3, %v2875_v7, %v655_v33 }
  0xb8   : > { %v785_v52 = vsel %vm753_vm3, %v2887_v18, %v657_v60 }
  0xba   : > { %v746_v62 = vpop.permute.xlu0 %745 }
  0xbb   : > { %v639_v42 = vpop.permute.xlu1 %638  ;;  %v820_v57 = vsel %vm790_vm4, %v783_v61, %v746_v62 }
  0xbc   : > { %2405 = vmatprep.mubr.msk.bf16.mxu1 %vm835_vm5, %v820_v57  ;;  %v767_v7 = vsel %vm753_vm3, %v2900_v27, %v639_v42 }
  0xbe   : > { %v748_v63 = vpop.permute.xlu0 %747 }
  0xbf   : > { %v641_v1 = vpop.permute.xlu1 %640  ;;  %v822_v3 = vsel %vm790_vm4, %v785_v52, %v748_v63 }
  0xc0   : > { %2406 = vmatmul.mubr.msk.bf16.gmra.mxu1 %vm835_vm5, %v822_v3  ;;  %v769_v5 = vsel %vm753_vm3, %v2919_v48, %v641_v1 }
  0xc1   : > { %2411 = vmatprep.mubr.msk.bf16.mxu1 %vm835_vm5, %v794_v8 }
  0xc2   : > { %v730_v9 = vpop.permute.xlu0 %729 }
  0xc3   : > { %v732_v12 = vpop.permute.xlu1 %731  ;;  %v804_v13 = vsel %vm790_vm4, %v767_v7, %v730_v9 }
  0xc4   : > { %v806_v18 = vsel %vm790_vm4, %v769_v5, %v732_v12  ;;  %2389 = vmatprep.mubr.msk.bf16.mxu0 %vm835_vm5, %v804_v13 }
  0xc5   : > { %2390 = vmatmul.mubr.msk.bf16.gmra.mxu0 %vm835_vm5, %v806_v18 }
  0xc6   : > { %2445 = vmatprep.mubr.msk.bf16.mxu0 %vm835_vm5, %v796_v43  ;;  %v659_v14 = vpop.permute.xlu0 %658 }
  0xc7   : > { %v750_v15 = vpop.permute.xlu1 %749  ;;  %v787_v27 = vsel %vm753_vm3, %v2924_v54, %v659_v14 }
  0xc8   : > { %2412 = vmatmul.mubr.msk.bf16.vlgmr.msra.gmra.mxu1 %vm835_vm5, %v796_v43  ;;  %v824_v48 = vsel %vm790_vm4, %v787_v27, %v750_v15 }
  0xc9   : > { %2415 = vmatprep.mubr.msk.bf16.mxu1 %vm835_vm5, %v798_v39 }
  0xca   : > { %v661_v20 = vpop.permute.xlu0 %660 }
  0xcb   : > { %v752_v17 = vpop.permute.xlu1 %751  ;;  %v789_v21 = vsel %vm753_vm3, %v2946_v11, %v661_v20 }
  0xcc   : > { %v826_v22 = vsel %vm790_vm4, %v789_v21, %v752_v17 }
  0xcd   : > { %2446 = vmatmul.mubr.msk.bf16.vlgmr.msra.gmra.mxu0 %vm835_vm5, %v798_v39 }
  0xce   : > { %2449 = vmatprep.mubr.msk.bf16.mxu0 %vm835_vm5, %v800_v56 }
  0xd0   : > { %2416 = vmatmul.mubr.msk.bf16.gmra.mxu1 %vm835_vm5, %v800_v56 }
  0xd1   : > { %2419 = vmatprep.mubr.msk.bf16.mxu1 %vm835_vm5, %v802_v59 }
  0xd5   : > { %2450 = vmatmul.mubr.msk.bf16.gmra.mxu0 %vm835_vm5, %v802_v59 }
  0xd6   : > { %2453 = vmatprep.mubr.msk.bf16.mxu0 %vm835_vm5, %v804_v13 }
  0xd8   : > { %2420 = vmatmul.mubr.msk.bf16.gmra.mxu1 %vm835_vm5, %v804_v13 }
  0xd9   : > { %2423 = vmatprep.mubr.msk.bf16.mxu1 %vm835_vm5, %v806_v18 }
  0xdd   : > { %2454 = vmatmul.mubr.msk.bf16.gmra.mxu0 %vm835_vm5, %v806_v18 }
  0xde   : > { %2457 = vmatprep.mubr.msk.bf16.mxu0 %vm835_vm5, %v3010_v16 }
  0xe0   : > { %2424 = vmatmul.mubr.msk.bf16.gmra.mxu1 %vm835_vm5, %v3010_v16 }
  0xe1   : > { %2427 = vmatprep.mubr.msk.bf16.mxu1 %vm835_vm5, %v3022_v26 }
  0xe5   : > { %2458 = vmatmul.mubr.msk.bf16.gmra.mxu0 %vm835_vm5, %v3022_v26 }
  0xe6   : > { %2461 = vmatprep.mubr.msk.bf16.mxu0 %vm835_vm5, %v3032_v35 }
  0xe8   : > { %2428 = vmatmul.mubr.msk.bf16.gmra.mxu1 %vm835_vm5, %v3032_v35 }
  0xe9   : > { %2431 = vmatprep.mubr.msk.bf16.mxu1 %vm835_vm5, %v3039_v29 }
  0xed   : > { %2462 = vmatmul.mubr.msk.bf16.gmra.mxu0 %vm835_vm5, %v3039_v29 }
  0xee   : > { %2465 = vmatprep.mubr.msk.bf16.mxu0 %vm835_vm5, %v3054_v50 }
  0xf0   : > { %2432 = vmatmul.mubr.msk.bf16.gmra.mxu1 %vm835_vm5, %v3054_v50  ;;  %v3177_v50 = vld [vmem:[%s3590_s2] ss:$0 sm:$0xff] }
  0xf1   : > { %2435 = vmatprep.mubr.msk.bf16.mxu1 %vm835_vm5, %v818_v53 }
  0xf5   : > { %2466 = vmatmul.mubr.msk.bf16.gmra.mxu0 %vm835_vm5, %v818_v53 }
  0xf6   : > { %2469 = vmatprep.mubr.msk.bf16.mxu0 %vm835_vm5, %v820_v57 }
  0xf8   : > { %2436 = vmatmul.mubr.msk.bf16.gmra.mxu1 %vm835_vm5, %v820_v57 }
  0xf9   : > { %2439 = vmatprep.mubr.msk.bf16.mxu1 %vm835_vm5, %v822_v3 }
  0xfd   : > { %2470 = vmatmul.mubr.msk.bf16.gmra.mxu0 %vm835_vm5, %v822_v3 }
  0xfe   : > { %2473 = vmatprep.mubr.msk.bf16.mxu0 %vm835_vm5, %v824_v48 }
 0x100   : > { %2440 = vmatmul.mubr.msk.bf16.gmra.mxu1 %vm835_vm5, %v824_v48 }
 0x105   : > { %2474 = vmatmul.mubr.msk.bf16.gmra.mxu0 %vm835_vm5, %v826_v22 }
 0x155   : > { %v3134_v54 = vpop.f32.mrf.mxu1 }
 0x156   : > { %v2379_v16 = vpop.f32.mrf.mxu0 }
 0x157   : > { %v3136_v11 = vpop.f32.mrf.mxu1  ;;  %v1041_v53 = vadd.f32 %v2379_v16, %v3177_v50 }
 0x158   : > { %v906_v24 = vpop.f32.mrf.mxu0 }
 0x159   : > { %v3138_v23 = vpop.f32.mrf.mxu1  ;;  %v1039_v34 = vadd.f32 %v3177_v50, %v906_v24 }
 0x15a   : > { %v2380_v8 = vpop.f32.mrf.mxu0 }
 0x15b   : > { %v3140_v2 = vpop.f32.mrf.mxu1  ;;  %v1042_v33 = vadd.f32 %v2380_v8, %v3177_v50 }
 0x15c   : > { %v909_v28 = vpop.f32.mrf.mxu0 }
 0x15d   : > { %v1040_v57 = vadd.f32 %v3177_v50, %v909_v28 }
 0x160   : > { %v3142_v26 = vpop.f32.mrf.mxu1 }
 0x162   : > { %v3144_v31 = vpop.f32.mrf.mxu1 }
 0x164   : > { %v3146_v6 = vpop.f32.mrf.mxu1 }
 0x165   : > { %v2383_v0 = vpop.f32.mrf.mxu0 }
 0x166   : > { %v3148_v35 = vpop.f32.mrf.mxu1  ;;  %v1045_v7 = vadd.f32 %v2383_v0, %v3177_v50 }
 0x167   : > { %v922_v32 = vpop.f32.mrf.mxu0 }
 0x168   : > { %v1043_v14 = vadd.f32 %v3177_v50, %v922_v32 }
 0x169   : > { %v2384_v36 = vpop.f32.mrf.mxu0 }
 0x16a   : > { %v1046_v21 = vadd.f32 %v2384_v36, %v3177_v50 }
 0x16b   : > { %v925_v38 = vpop.f32.mrf.mxu0 }
 0x16c   : > { %v1044_v0 = vadd.f32 %v3177_v50, %v925_v38 }
 0x170   : > { %v3150_v37 = vpop.f32.mrf.mxu1 }
 0x172   : > { %v3152_v29 = vpop.f32.mrf.mxu1 }
 0x174   : > { %v3154_v30 = vpop.f32.mrf.mxu1 }
 0x175   : > { %v2387_v25 = vpop.f32.mrf.mxu0 }
 0x176   : > { %v3158_v41 = vpop.f32.mrf.mxu1  ;;  %v1049_v36 = vadd.f32 %v2387_v25, %v3177_v50 }
 0x177   : > { %v3156_v40 = vpop.f32.mrf.mxu0 }
 0x178   : > { %v1047_v38 = vadd.f32 %v3177_v50, %v3156_v40 }
 0x179   : > { %v3160_v43 = vpop.f32.mrf.mxu0 }
 0x17a   : > { %v1050_v25 = vadd.f32 %v3160_v43, %v3177_v50 }
 0x17b   : > { %v3166_v46 = vpop.f32.mrf.mxu0 }
 0x180   : > { %v3162_v39 = vpop.f32.mrf.mxu1 }
 0x182   : > { %v3164_v45 = vpop.f32.mrf.mxu1 }
 0x184   : > { %v3168_v47 = vpop.f32.mrf.mxu1 }
 0x185   : > { %v3170_v49 = vpop.f32.mrf.mxu0 }
 0x186   : > { %v3172_v44 = vpop.f32.mrf.mxu1 }
 0x187   : > { %v3179_v4 = vpop.f32.mrf.mxu0 }
 0x188   : > { %v2413_v51 = vpop.f32.mrf.mxu1 }
 0x189   : > { %v3181_v19 = vpop.f32.mrf.mxu0  ;;  %v1247_v58 = vadd.f32 %v2413_v51, %v1041_v53 }
 0x18a   : > { %v1118_v10 = vpop.f32.mrf.mxu1 }
 0x18b   : > { %v3184_v55 = vpop.f32.mrf.mxu0  ;;  %v1245_v60 = vadd.f32 %v1118_v10, %v1039_v34 }
 0x18c   : > { %v2414_v56 = vpop.f32.mrf.mxu1 }
 0x18d   : > { %v2447_v59 = vpop.f32.mrf.mxu0  ;;  %v1248_v52 = vadd.f32 %v2414_v56, %v1042_v33 }
 0x18e   : > { %v3188_v61 = vadd.f32 %v2447_v59, %v1247_v58  ;;  %v1121_v62 = vpop.f32.mrf.mxu1 }
 0x18f   : > { %v1324_v42 = vpop.f32.mrf.mxu0  ;;  %v1246_v9 = vadd.f32 %v1121_v62, %v1040_v57 }
 0x190   : > { %v2195_v63 = vmul.f32 -1.442695, %v3188_v61  ;;  %v3192_v1 = vadd.f32 %v1324_v42, %v1245_v60  ;;  %v2417_v3 = vpop.f32.mrf.mxu1 }
 0x191   : > { %v2448_v5 = vpop.f32.mrf.mxu0  ;;  %v1251_v27 = vadd.f32 %v2417_v3, %v1045_v7 }
 0x192   : > { %2550 = vpow2.f32 %v2195_v63  ;;  %v2193_v12 = vmul.f32 -1.442695, %v3192_v1  ;;  %v3196_v13 = vadd.f32 %v2448_v5, %v1248_v52  ;;  %v1134_v18 = vpop.f32.mrf.mxu1 }
 0x193   : > { %v1327_v15 = vpop.f32.mrf.mxu0  ;;  %v1249_v16 = vadd.f32 %v1134_v18, %v1043_v14  ;;  %v1048_v18 = vadd.f32 %v3177_v50, %v3166_v46  ;;  %v1053_v46 = vadd.f32 %v3170_v49, %v3177_v50 }
 0x194   : > { %2552 = vpow2.f32 %v2193_v12  ;;  %v2196_v48 = vmul.f32 -1.442695, %v3196_v13  ;;  %v3200_v20 = vadd.f32 %v1327_v15, %v1246_v9  ;;  %v2418_v17 = vpop.f32.mrf.mxu1 }
 0x195   : > { %v2451_v22 = vpop.f32.mrf.mxu0  ;;  %v1252_v51 = vadd.f32 %v2418_v17, %v1046_v21 }
 0x196   : > { %2554 = vpow2.f32 %v2196_v48  ;;  %v2194_v24 = vmul.f32 -1.442695, %v3200_v20  ;;  %v3204_v8 = vadd.f32 %v2451_v22, %v1251_v27  ;;  %v1137_v28 = vpop.f32.mrf.mxu1  ;;  %v1057_v22 = vadd.f32 %v3134_v54, %v3177_v50 }
 0x197   : > { %v1340_v32 = vpop.f32.mrf.mxu0  ;;  %v1250_v56 = vadd.f32 %v1137_v28, %v1044_v0  ;;  %v3242_v54 = vadd.f32 %v3138_v23, %v3177_v50  ;;  %v1054_v23 = vadd.f32 %v3181_v19, %v3177_v50 }
 0x198   : > { %2556 = vpow2.f32 %v2194_v24  ;;  %v2199_v53 = vmul.f32 -1.442695, %v3204_v8  ;;  %v3208_v10 = vadd.f32 %v1340_v32, %v1249_v16  ;;  %v2421_v34 = vpop.f32.mrf.mxu1  ;;  %v3233_v16 = vadd.f32 %v3177_v50, %v3136_v11 }
 0x199   : > { %v2452_v58 = vpop.f32.mrf.mxu0  ;;  %v1255_v42 = vadd.f32 %v2421_v34, %v1049_v36  ;;  %v1051_v11 = vadd.f32 %v3177_v50, %v3179_v4 }
 0x19a   : > { %2558 = vpow2.f32 %v2199_v53  ;;  %v2197_v59 = vmul.f32 -1.442695, %v3208_v10  ;;  %v3212_v33 = vadd.f32 %v2452_v58, %v1252_v51  ;;  %v1150_v60 = vpop.f32.mrf.mxu1 }
 0x19b   : > { %v1343_v62 = vpop.f32.mrf.mxu0  ;;  %v1253_v7 = vadd.f32 %v1150_v60, %v1047_v38 }
 0x19c   : > { %2560 = vpow2.f32 %v2197_v59  ;;  %v2200_v57 = vmul.f32 -1.442695, %v3212_v33  ;;  %v3217_v52 = vadd.f32 %v1343_v62, %v1250_v56  ;;  %v2422_v63 = vpop.f32.mrf.mxu1  ;;  %v3251_v62 = vadd.f32 %v3177_v50, %v3140_v2 }
 0x19d   : > { %v2455_v3 = vpop.f32.mrf.mxu0  ;;  %v1256_v14 = vadd.f32 %v2422_v63, %v1050_v25  ;;  %v1052_v2 = vadd.f32 %v3177_v50, %v3184_v55 }
 0x19e   : > { %2562 = vpow2.f32 %v2200_v57  ;;  %v2198_v5 = vmul.f32 -1.442695, %v3217_v52  ;;  %v3222_v9 = vadd.f32 %v2455_v3, %v1255_v42  ;;  %v1153_v12 = vpop.f32.mrf.mxu1 }
 0x19f   : > { %v2551_v40 = vpop.eup %2550  ;;  %v1356_v15 = vpop.f32.mrf.mxu0  ;;  %v1254_v24 = vadd.f32 %v1153_v12, %v1048_v18 }
 0x1a0   : > { %v1581_v27 = vadd.f32 1.0, %v2551_v40  ;;  %2564 = vpow2.f32 %v2198_v5  ;;  %v2203_v48 = vmul.f32 -1.442695, %v3222_v9  ;;  %v3227_v17 = vadd.f32 %v1356_v15, %v1253_v7  ;;  %v2425_v43 = vpop.f32.mrf.mxu1 }
 0x1a1   : > { %v2553_v21 = vpop.eup %2552  ;;  %v2456_v28 = vpop.f32.mrf.mxu0  ;;  %v1259_v36 = vadd.f32 %v2425_v43, %v1053_v46  ;;  %v3260_v5 = vadd.f32 %v3142_v26, %v3177_v50  ;;  %v3273_v26 = vadd.f32 %v3146_v6, %v3177_v50  ;;  %v3284_v6 = vadd.f32 %v3150_v37, %v3177_v50 }
 0x1a2   : > { %2566 = vrcp.f32 %v1581_v27  ;;  %v1579_v0 = vadd.f32 1.0, %v2553_v21  ;;  %v2201_v32 = vmul.f32 -1.442695, %v3227_v17  ;;  %v3238_v51 = vadd.f32 %v2456_v28, %v1256_v14  ;;  %v1166_v53 = vpop.f32.mrf.mxu1 }
 0x1a3   : > { %v2555_v34 = vpop.eup %2554  ;;  %2568 = vpow2.f32 %v2203_v48  ;;  %v1359_v49 = vpop.f32.mrf.mxu0  ;;  %v1257_v4 = vadd.f32 %v1166_v53, %v1051_v11  ;;  %v3269_v48 = vadd.f32 %v3177_v50, %v3144_v31  ;;  %v3280_v31 = vadd.f32 %v3177_v50, %v3148_v35 }
 0x1a4   : > { %2570 = vrcp.f32 %v1579_v0  ;;  %v1582_v58 = vadd.f32 1.0, %v2555_v34  ;;  %v2204_v56 = vmul.f32 -1.442695, %v3238_v51  ;;  %v3247_v59 = vadd.f32 %v1359_v49, %v1254_v24  ;;  %v2426_v60 = vpop.f32.mrf.mxu1 }
 0x1a5   : > { %v2557_v38 = vpop.eup %2556  ;;  %2572 = vpow2.f32 %v2201_v32  ;;  %v2459_v42 = vpop.f32.mrf.mxu0  ;;  %v1260_v19 = vadd.f32 %v2426_v60, %v1054_v23  ;;  %v3291_v35 = vadd.f32 %v3177_v50, %v3152_v29  ;;  %v3304_v29 = vadd.f32 %v3177_v50, %v3158_v41 }
 0x1a6   : > { %2574 = vrcp.f32 %v1582_v58  ;;  %v1580_v57 = vadd.f32 1.0, %v2557_v38  ;;  %v2202_v63 = vmul.f32 -1.442695, %v3247_v59  ;;  %v3256_v25 = vadd.f32 %v2459_v42, %v1259_v36  ;;  %v1169_v3 = vpop.f32.mrf.mxu1 }
 0x1a7   : > { %v2559_v7 = vpop.eup %2558  ;;  %2576 = vpow2.f32 %v2204_v56  ;;  %v1372_v12 = vpop.f32.mrf.mxu0  ;;  %v1258_v55 = vadd.f32 %v1169_v3, %v1052_v2  ;;  %v3295_v56 = vadd.f32 %v3154_v30, %v3177_v50  ;;  %v3308_v30 = vadd.f32 %v3162_v39, %v3177_v50 }
 0x1a8   : > { %2578 = vrcp.f32 %v1580_v57  ;;  %v1585_v40 = vadd.f32 1.0, %v2559_v7  ;;  %v2207_v18 = vmul.f32 -1.442695, %v3256_v25  ;;  %v3265_v14 = vadd.f32 %v1372_v12, %v1257_v4  ;;  %v2429_v15 = vpop.f32.mrf.mxu1 }
 0x1a9   : > { %v2561_v27 = vpop.eup %2560  ;;  %2580 = vpow2.f32 %v2202_v63  ;;  %v2460_v43 = vpop.f32.mrf.mxu0  ;;  %v1263_v32 = vadd.f32 %v2429_v15, %v1057_v22 }
 0x1aa   : > { %2582 = vrcp.f32 %v1585_v40  ;;  %v1583_v21 = vadd.f32 1.0, %v2561_v27  ;;  %v2205_v46 = vmul.f32 -1.442695, %v3265_v14  ;;  %v3276_v24 = vadd.f32 %v2460_v43, %v1260_v19  ;;  %v1182_v28 = vpop.f32.mrf.mxu1 }
 0x1ab   : > { %v2563_v0 = vpop.eup %2562  ;;  %2584 = vpow2.f32 %v2207_v18  ;;  %v1375_v53 = vpop.f32.mrf.mxu0  ;;  %v1261_v37 = vadd.f32 %v1182_v28, %v3233_v16  ;;  %v3312_v16 = vadd.f32 %v3177_v50, %v3164_v45 }
 0x1ac   : > { %2586 = vrcp.f32 %v1583_v21  ;;  %v1586_v34 = vadd.f32 1.0, %v2563_v0  ;;  %v2208_v11 = vmul.f32 -1.442695, %v3276_v24  ;;  %v3287_v36 = vadd.f32 %v1375_v53, %v1258_v55  ;;  %v2430_v49 = vpop.f32.mrf.mxu1 }
 0x1ad   : > { %v2565_v58 = vpop.eup %2564  ;;  %2588 = vpow2.f32 %v2205_v46  ;;  %v2463_v22 = vpop.f32.mrf.mxu0  ;;  %v1264_v45 = vadd.f32 %v2430_v49, %v3242_v54 }
 0x1ae   : > { %2590 = vrcp.f32 %v1586_v34  ;;  %v1584_v60 = vadd.f32 1.0, %v2565_v58  ;;  %v2206_v38 = vmul.f32 -1.442695, %v3287_v36  ;;  %v3300_v23 = vadd.f32 %v2463_v22, %v1263_v32  ;;  %v1185_v4 = vpop.f32.mrf.mxu1 }
 0x1af   : > { %v2567_v42 = vpop.eup %2566  ;;  %2592 = vpow2.f32 %v2208_v11  ;;  %v1388_v57 = vpop.f32.mrf.mxu0  ;;  %v1262_v12 = vadd.f32 %v1185_v4, %v3251_v62 }
 0x1b0   : > { %v2569_v63 = vpop.eup %2568  ;;  %v1677_v3 = vmul.f32 %v2567_v42, %v3188_v61  ;;  %2594 = vrcp.f32 %v1584_v60  ;;  %v2211_v7 = vmul.f32 -1.442695, %v3300_v23  ;;  %v3316_v2 = vadd.f32 %v1388_v57, %v1261_v37  ;;  %v2433_v41 = vpop.f32.mrf.mxu1 }
 0x1b1   : > { %v2571_v19 = vpop.eup %2570  ;;  %v1589_v39 = vadd.f32 1.0, %v2569_v63  ;;  %2596 = vpow2.f32 %v2206_v38  ;;  %v2464_v61 = vpop.f32.mrf.mxu0  ;;  %v1267_v46 = vadd.f32 %v2433_v41, %v3260_v5  ;;  %v3338_v5 = vadd.f32 %v3168_v47, %v3177_v50 }
 0x1b2   : > { %v2573_v40 = vpop.eup %2572  ;;  %v2294_v18 = vpack.c.bf16 %v1677_v3, %v1677_v3  ;;  %v1675_v15 = vmul.f32 %v2571_v19, %v3192_v1  ;;  %2598 = vpow2.f32 %v2211_v7  ;;  %v2209_v27 = vmul.f32 -1.442695, %v3316_v2  ;;  %v1198_v55 = vpop.f32.mrf.mxu1 }
 0x1b3   : > { %v2575_v43 = vpop.eup %2574  ;;  %2600 = vrcp.f32 %v1589_v39  ;;  %v1587_v21 = vadd.f32 1.0, %v2573_v40  ;;  %v3328_v28 = vadd.f32 %v2464_v61, %v1264_v45  ;;  %v1391_v54 = vpop.f32.mrf.mxu0  ;;  %v1265_v57 = vadd.f32 %v1198_v55, %v3269_v48 }
 0x1b4   : > { %v2577_v0 = vpop.eup %2576  ;;  %1838 = vst.msk [vmem:[%s3321_s6 + $0x10] sm:$0xf] %vm1835_vm6, %v2294_v18  ;;  %v2292_v62 = vpack.c.bf16 %v1675_v15, %v1675_v15  ;;  %v1678_v32 = vmul.f32 %v2575_v43, %v3196_v13  ;;  %2602 = vpow2.f32 %v2209_v27  ;;  %v3333_v1 = vadd.f32 %v1391_v54, %v1262_v12  ;;  %v2434_v53 = vpop.f32.mrf.mxu1  ;;  %1872 = vrot.lane.b32.xlu0 %v2294_v18, %s2704_s7 }
 0x1b5   : > { %v2579_v34 = vpop.eup %2578  ;;  %2604 = vrcp.f32 %v1587_v21  ;;  %v1590_v11 = vadd.f32 1.0, %v2577_v0  ;;  %v2212_v49 = vmul.f32 -1.442695, %v3328_v28  ;;  %v2467_v58 = vpop.f32.mrf.mxu0  ;;  %v1268_v63 = vadd.f32 %v2434_v53, %v3273_v26 }
 0x1b6   : > { %v2581_v37 = vpop.eup %2580  ;;  %1836 = vst.msk [vmem:[%s3321_s6] sm:$0xf] %vm1835_vm6, %v2292_v62  ;;  %v2295_v13 = vpack.c.bf16 %v1678_v32, %v1678_v32  ;;  %v1676_v22 = vmul.f32 %v2579_v34, %v3200_v20  ;;  %v2210_v60 = vmul.f32 -1.442695, %v3333_v1  ;;  %v3345_v38 = vadd.f32 %v2467_v58, %v1267_v46  ;;  %v1201_v4 = vpop.f32.mrf.mxu1 }
 0x1b7   : > { %v2583_v42 = vpop.eup %2582  ;;  %2606 = vrcp.f32 %v1590_v11  ;;  %v1588_v47 = vadd.f32 1.0, %v2581_v37  ;;  %v1404_v3 = vpop.f32.mrf.mxu0  ;;  %v1266_v26 = vadd.f32 %v1201_v4, %v3280_v31 }
 0x1b8   : > { %v2585_v7 = vpop.eup %2584  ;;  %1839 = vst.msk [vmem:[%s3321_s6 + $0x14] sm:$0xf] %vm1835_vm6, %v2295_v13  ;;  %v2293_v41 = vpack.c.bf16 %v1676_v22, %v1676_v22  ;;  %v1681_v20 = vmul.f32 %v2583_v42, %v3204_v8  ;;  %2608 = vpow2.f32 %v2212_v49  ;;  %v2215_v19 = vmul.f32 -1.442695, %v3345_v38  ;;  %v2437_v39 = vpop.f32.mrf.mxu1  ;;  %1868 = vrot.lane.b32.xlu0 %v2292_v62, %s2704_s7  ;;  %1874 = vrot.lane.b32.xlu1 %v2295_v13, %s2704_s7 }
 0x1b9   : > { %v2587_v45 = vpop.eup %2586  ;;  %2610 = vrcp.f32 %v1588_v47  ;;  %v1593_v48 = vadd.f32 1.0, %v2585_v7  ;;  %v3356_v12 = vadd.f32 %v1404_v3, %v1265_v57  ;;  %v2468_v61 = vpop.f32.mrf.mxu0  ;;  %v1271_v31 = vadd.f32 %v2437_v39, %v3284_v6 }
 0x1ba   : > { %v2589_v40 = vpop.eup %2588  ;;  %1837 = vst.msk [vmem:[%s3321_s6 + $0x4] sm:$0xf] %vm1835_vm6, %v2293_v41  ;;  %v2298_v8 = vpack.c.bf16 %v1681_v20, %v1681_v20  ;;  %v1679_v18 = vmul.f32 %v2587_v45, %v3208_v10  ;;  %2612 = vpow2.f32 %v2210_v60  ;;  %v3361_v15 = vadd.f32 %v2468_v61, %v1268_v63  ;;  %v1214_v27 = vpop.f32.mrf.mxu1 }
 0x1bb   : > { %v2591_v55 = vpop.eup %2590  ;;  %2614 = vrcp.f32 %v1593_v48  ;;  %v1591_v43 = vadd.f32 1.0, %v2589_v40  ;;  %v2213_v21 = vmul.f32 -1.442695, %v3356_v12  ;;  %v1407_v46 = vpop.f32.mrf.mxu0  ;;  %v3373_v6 = vadd.f32 %v3177_v50, %v3172_v44 }
 0x1bc   : > { %v2593_v54 = vpop.eup %2592  ;;  %1842 = vst.msk [vmem:[%s3321_s6 + $0x30] sm:$0xf] %vm1835_vm6, %v2298_v8  ;;  %v2296_v0 = vpack.c.bf16 %v1679_v18, %v1679_v18  ;;  %v1682_v62 = vmul.f32 %v2591_v55, %v3212_v33  ;;  %2616 = vpow2.f32 %v2215_v19  ;;  %v2216_v10 = vmul.f32 -1.442695, %v3361_v15  ;;  %v2438_v32 = vpop.f32.mrf.mxu1  ;;  %1870 = vrot.lane.b32.xlu1 %v2293_v41, %s2704_s7  ;;  %1880 = vrot.lane.b32.xlu0 %v2298_v8, %s2704_s7 }
 0x1bd   : > { %v2595_v53 = vpop.eup %2594  ;;  %2618 = vrcp.f32 %v1591_v43  ;;  %v1594_v34 = vadd.f32 1.0, %v2593_v54  ;;  %v3375_v11 = vadd.f32 %v1407_v46, %v1266_v26  ;;  %v2471_v49 = vpop.f32.mrf.mxu0  ;;  %v1269_v50 = vadd.f32 %v1214_v27, %v3291_v35 }
 0x1be   : > { %v2597_v33 = vpop.eup %2596  ;;  %1840 = vst.msk [vmem:[%s3321_s6 + $0x20] sm:$0xf] %vm1835_vm6, %v2296_v0  ;;  %v2299_v58 = vpack.c.bf16 %v1682_v62, %v1682_v62  ;;  %v1680_v37 = vmul.f32 %v2595_v53, %v3217_v52  ;;  %2620 = vpow2.f32 %v2213_v21  ;;  %v3380_v13 = vadd.f32 %v2471_v49, %v1271_v31  ;;  %v1217_v22 = vpop.f32.mrf.mxu1 }
 0x1bf   : > { %v2599_v60 = vpop.eup %2598  ;;  %2622 = vrcp.f32 %v1594_v34  ;;  %v1592_v44 = vadd.f32 1.0, %v2597_v33  ;;  %v2214_v4 = vmul.f32 -1.442695, %v3375_v11  ;;  %v1420_v42 = vpop.f32.mrf.mxu0  ;;  %v1272_v52 = vadd.f32 %v2438_v32, %v3295_v56 }
 0x1c0   : > { %v2601_v47 = vpop.eup %2600  ;;  %1843 = vst.msk [vmem:[%s3321_s6 + $0x34] sm:$0xf] %vm1835_vm6, %v2299_v58  ;;  %v2297_v57 = vpack.c.bf16 %v1680_v37, %v1680_v37  ;;  %v1597_v63 = vadd.f32 1.0, %v2599_v60  ;;  %2624 = vpow2.f32 %v2216_v10  ;;  %1876 = vrot.lane.b32.xlu0 %v2296_v0, %s2704_s7  ;;  %1882 = vrot.lane.b32.xlu1 %v2299_v58, %s2704_s7  ;;  %v2441_v3 = vpop.f32.mrf.mxu1  ;;  %v2219_v41 = vmul.f32 -1.442695, %v3380_v13 }
 0x1c1   : > { %v2603_v7 = vpop.eup %2602  ;;  %v1685_v35 = vmul.f32 %v2601_v47, %v3222_v9  ;;  %2626 = vrcp.f32 %v1592_v44  ;;  %v3391_v20 = vadd.f32 %v1420_v42, %v1269_v50  ;;  %v2472_v19 = vpop.f32.mrf.mxu0  ;;  %v1270_v56 = vadd.f32 %v1217_v22, %v3304_v29 }
 0x1c2   : > { %v2605_v39 = vpop.eup %2604  ;;  %1841 = vst.msk [vmem:[%s3321_s6 + $0x24] sm:$0xf] %vm1835_vm6, %v2297_v57  ;;  %2628 = vrcp.f32 %v1597_v63  ;;  %v1595_v45 = vadd.f32 1.0, %v2603_v7  ;;  %v3396_v48 = vadd.f32 %v2472_v19, %v1272_v52  ;;  %v1230_v26 = vpop.f32.mrf.mxu1  ;;  %v1275_v27 = vadd.f32 %v2441_v3, %v3308_v30 }
 0x1c3   : > { %v2302_v61 = vpack.c.bf16 %v1685_v35, %v1685_v35  ;;  %v1683_v9 = vmul.f32 %v2605_v39, %v3227_v17  ;;  %2630 = vpow2.f32 %v2214_v4  ;;  %v2217_v40 = vmul.f32 -1.442695, %v3391_v20  ;;  %v1423_v8 = vpop.f32.mrf.mxu0 }
 0x1c4   : > { %v2607_v18 = vpop.eup %2606  ;;  %2632 = vrcp.f32 %v1595_v45  ;;  %v2220_v55 = vmul.f32 -1.442695, %v3396_v48  ;;  %v3402_v43 = vadd.f32 %v1423_v8, %v1270_v56  ;;  %1878 = vrot.lane.b32.xlu1 %v2297_v57, %s2704_s7  ;;  %v2442_v29 = vpop.f32.mrf.mxu1  ;;  %v1273_v46 = vadd.f32 %v1230_v26, %v3312_v16 }
 0x1c5   : > { %v2609_v21 = vpop.eup %2608  ;;  %1846 = vst.msk [vmem:[%s3321_s6 + $0x50] sm:$0xf] %vm1835_vm6, %v2302_v61  ;;  %v2300_v17 = vpack.c.bf16 %v1683_v9, %v1683_v9  ;;  %v1686_v31 = vmul.f32 %v2607_v18, %v3238_v51  ;;  %2634 = vpow2.f32 %v2219_v41  ;;  %1888 = vrot.lane.b32.xlu0 %v2302_v61, %s2704_s7  ;;  %v2475_v30 = vpop.f32.mrf.mxu0  ;;  %v1276_v16 = vadd.f32 %v2442_v29, %v3338_v5 }
 0x1c6   : > { %v2611_v54 = vpop.eup %2610  ;;  %v1598_v0 = vadd.f32 1.0, %v2609_v21  ;;  %2636 = vpow2.f32 %v2217_v40  ;;  %v2218_v62 = vmul.f32 -1.442695, %v3402_v43  ;;  %v3411_v10 = vadd.f32 %v2475_v30, %v1275_v27  ;;  %v1233_v32 = vpop.f32.mrf.mxu1 }
 0x1c7   : > { %v2613_v53 = vpop.eup %2612  ;;  %1844 = vst.msk [vmem:[%s3321_s6 + $0x40] sm:$0xf] %vm1835_vm6, %v2300_v17  ;;  %v2303_v34 = vpack.c.bf16 %v1686_v31, %v1686_v31  ;;  %v1684_v51 = vmul.f32 %v2611_v54, %v3247_v59  ;;  %2638 = vpow2.f32 %v2220_v55  ;;  %v1436_v49 = vpop.f32.mrf.mxu0  ;;  %v1274_v59 = vadd.f32 %v1233_v32, %v3373_v6 }
 0x1c8   : > { %v2615_v33 = vpop.eup %2614  ;;  %2640 = vrcp.f32 %v1598_v0  ;;  %v1596_v58 = vadd.f32 1.0, %v2613_v53  ;;  %v2223_v37 = vmul.f32 -1.442695, %v3411_v10  ;;  %v3418_v22 = vadd.f32 %v1436_v49, %v1273_v46 }
 0x1c9   : > { %v2617_v60 = vpop.eup %2616  ;;  %1847 = vst.msk [vmem:[%s3321_s6 + $0x54] sm:$0xf] %vm1835_vm6, %v2303_v34  ;;  %v2301_v44 = vpack.c.bf16 %v1684_v51, %v1684_v51  ;;  %v1689_v50 = vmul.f32 %v2615_v33, %v3256_v25  ;;  %2642 = vpow2.f32 %v2218_v62  ;;  %1884 = vrot.lane.b32.xlu0 %v2300_v17, %s2704_s7  ;;  %1890 = vrot.lane.b32.xlu1 %v2303_v34, %s2704_s7  ;;  %v2476_v5 = vpop.f32.mrf.mxu0 }
 0x1ca   : > { %v2619_v4 = vpop.eup %2618  ;;  %2644 = vrcp.f32 %v1596_v58  ;;  %v1601_v42 = vadd.f32 1.0, %v2617_v60  ;;  %v2221_v47 = vmul.f32 -1.442695, %v3418_v22  ;;  %v3427_v57 = vadd.f32 %v2476_v5, %v1276_v16 }
 0x1cb   : > { %v2621_v63 = vpop.eup %2620  ;;  %1845 = vst.msk [vmem:[%s3321_s6 + $0x44] sm:$0xf] %vm1835_vm6, %v2301_v44  ;;  %v2306_v25 = vpack.c.bf16 %v1689_v50, %v1689_v50  ;;  %v1687_v52 = vmul.f32 %v2619_v4, %v3265_v14  ;;  %2646 = vpow2.f32 %v2223_v37  ;;  %v1439_v6 = vpop.f32.mrf.mxu0 }
 0x1cc   : > { %v2623_v3 = vpop.eup %2622  ;;  %2648 = vrcp.f32 %v1601_v42  ;;  %v1599_v7 = vadd.f32 1.0, %v2621_v63  ;;  %v2224_v35 = vmul.f32 -1.442695, %v3427_v57  ;;  %v3433_v41 = vadd.f32 %v1439_v6, %v1274_v59 }
 0x1cd   : > { %v2625_v19 = vpop.eup %2624  ;;  %1850 = vst.msk [vmem:[%s3321_s6 + $0x70] sm:$0xf] %vm1835_vm6, %v2306_v25  ;;  %v2304_v39 = vpack.c.bf16 %v1687_v52, %v1687_v52  ;;  %v1690_v45 = vmul.f32 %v2623_v3, %v3276_v24  ;;  %2650 = vpow2.f32 %v2221_v47  ;;  %1886 = vrot.lane.b32.xlu1 %v2301_v44, %s2704_s7  ;;  %1896 = vrot.lane.b32.xlu0 %v2306_v25, %s2704_s7 }
 0x1ce   : > { %v2627_v14 = vpop.eup %2626  ;;  %2652 = vrcp.f32 %v1599_v7  ;;  %v1602_v56 = vadd.f32 1.0, %v2625_v19  ;;  %v2222_v26 = vmul.f32 -1.442695, %v3433_v41 }
 0x1cf   : > { %v2629_v61 = vpop.eup %2628  ;;  %1848 = vst.msk [vmem:[%s3321_s6 + $0x60] sm:$0xf] %vm1835_vm6, %v2304_v39  ;;  %v2307_v9 = vpack.c.bf16 %v1690_v45, %v1690_v45  ;;  %v1688_v40 = vmul.f32 %v2627_v14, %v3287_v36  ;;  %2654 = vpow2.f32 %v2224_v35 }
 0x1d0   : > { %v2631_v24 = vpop.eup %2630  ;;  %v1693_v8 = vmul.f32 %v2629_v61, %v3300_v23  ;;  %2656 = vrcp.f32 %v1602_v56 }
 0x1d1   : > { %v2633_v18 = vpop.eup %2632  ;;  %1851 = vst.msk [vmem:[%s3321_s6 + $0x74] sm:$0xf] %vm1835_vm6, %v2307_v9  ;;  %v2305_v27 = vpack.c.bf16 %v1688_v40, %v1688_v40  ;;  %v1600_v55 = vadd.f32 1.0, %v2631_v24  ;;  %2658 = vpow2.f32 %v2222_v26  ;;  %1892 = vrot.lane.b32.xlu0 %v2304_v39, %s2704_s7  ;;  %1898 = vrot.lane.b32.xlu1 %v2307_v9, %s2704_s7 }
 0x1d2   : > { %v2635_v29 = vpop.eup %2634  ;;  %v2310_v21 = vpack.c.bf16 %v1693_v8, %v1693_v8  ;;  %v1691_v36 = vmul.f32 %v2633_v18, %v3316_v2 }
 0x1d3   : > { %v2637_v17 = vpop.eup %2636  ;;  %1849 = vst.msk [vmem:[%s3321_s6 + $0x64] sm:$0xf] %vm1835_vm6, %v2305_v27  ;;  %2660 = vrcp.f32 %v1600_v55  ;;  %v1605_v23 = vadd.f32 1.0, %v2635_v29 }
 0x1d4   : > { %v2639_v31 = vpop.eup %2638  ;;  %1854 = vst.msk [vmem:[%s3321_s6 + $0x90] sm:$0xf] %vm1835_vm6, %v2310_v21  ;;  %v2308_v46 = vpack.c.bf16 %v1691_v36, %v1691_v36  ;;  %v1603_v30 = vadd.f32 1.0, %v2637_v17 }
 0x1d5   : > { %v2641_v54 = vpop.eup %2640  ;;  %2662 = vrcp.f32 %v1605_v23  ;;  %v1606_v0 = vadd.f32 1.0, %v2639_v31  ;;  %1904 = vrot.lane.b32.xlu0 %v2310_v21, %s2704_s7  ;;  %1894 = vrot.lane.b32.xlu1 %v2305_v27, %s2704_s7 }
 0x1d6   : > { %v2643_v62 = vpop.eup %2642  ;;  %1852 = vst.msk [vmem:[%s3321_s6 + $0x80] sm:$0xf] %vm1835_vm6, %v2308_v46  ;;  %v1694_v2 = vmul.f32 %v2641_v54, %v3328_v28  ;;  %2664 = vrcp.f32 %v1603_v30 }
 0x1d7   : > { %v2645_v32 = vpop.eup %2644  ;;  %2666 = vrcp.f32 %v1606_v0  ;;  %v1604_v53 = vadd.f32 1.0, %v2643_v62 }
 0x1d8   : > { %v2647_v34 = vpop.eup %2646  ;;  %v2311_v51 = vpack.c.bf16 %v1694_v2, %v1694_v2  ;;  %v1692_v16 = vmul.f32 %v2645_v32, %v3333_v1 }
 0x1d9   : > { %v2649_v49 = vpop.eup %2648  ;;  %2668 = vrcp.f32 %v1604_v53  ;;  %v1609_v33 = vadd.f32 1.0, %v2647_v34  ;;  %1900 = vrot.lane.b32.xlu0 %v2308_v46, %s2704_s7 }
 0x1da   : > { %v2651_v58 = vpop.eup %2650  ;;  %1855 = vst.msk [vmem:[%s3321_s6 + $0x94] sm:$0xf] %vm1835_vm6, %v2311_v51  ;;  %v2309_v37 = vpack.c.bf16 %v1692_v16, %v1692_v16  ;;  %v1697_v28 = vmul.f32 %v2649_v49, %v3345_v38  ;;  %1906 = vrot.lane.b32.xlu1 %v2311_v51, %s2704_s7 }
 0x1db   : > { %v2653_v60 = vpop.eup %2652  ;;  %2670 = vrcp.f32 %v1609_v33  ;;  %v1607_v44 = vadd.f32 1.0, %v2651_v58 }
 0x1dc   : > { %v2655_v50 = vpop.eup %2654  ;;  %1853 = vst.msk [vmem:[%s3321_s6 + $0x84] sm:$0xf] %vm1835_vm6, %v2309_v37  ;;  %v2314_v1 = vpack.c.bf16 %v1697_v28, %v1697_v28  ;;  %v1695_v59 = vmul.f32 %v2653_v60, %v3356_v12 }
 0x1dd   : > { %v2657_v5 = vpop.eup %2656  ;;  %2672 = vrcp.f32 %v1607_v44  ;;  %v1610_v4 = vadd.f32 1.0, %v2655_v50 }
 0x1de   : > { %v2659_v42 = vpop.eup %2658  ;;  %1858 = vst.msk [vmem:[%s3321_s6 + $0xb0] sm:$0xf] %vm1835_vm6, %v2314_v1  ;;  %v2312_v38 = vpack.c.bf16 %v1695_v59, %v1695_v59  ;;  %v1698_v47 = vmul.f32 %v2657_v5, %v3361_v15  ;;  %1912 = vrot.lane.b32.xlu0 %v2314_v1, %s2704_s7  ;;  %1902 = vrot.lane.b32.xlu1 %v2309_v37, %s2704_s7 }
 0x1df   : > { %2674 = vrcp.f32 %v1610_v4  ;;  %v1608_v63 = vadd.f32 1.0, %v2659_v42 }
 0x1e0   : > { %v2661_v25 = vpop.eup %2660  ;;  %1856 = vst.msk [vmem:[%s3321_s6 + $0xa0] sm:$0xf] %vm1835_vm6, %v2312_v38  ;;  %v2315_v12 = vpack.c.bf16 %v1698_v47, %v1698_v47 }
 0x1e1   : > { %v1696_v52 = vmul.f32 %v2661_v25, %v3375_v11  ;;  %2676 = vrcp.f32 %v1608_v63 }
 0x1e2   : > { %v2663_v6 = vpop.eup %2662  ;;  %1859 = vst.msk [vmem:[%s3321_s6 + $0xb4] sm:$0xf] %vm1835_vm6, %v2315_v12  ;;  %1908 = vrot.lane.b32.xlu0 %v2312_v38, %s2704_s7  ;;  %1914 = vrot.lane.b32.xlu1 %v2315_v12, %s2704_s7 }
 0x1e3   : > { %v2665_v15 = vpop.eup %2664  ;;  %v2313_v3 = vpack.c.bf16 %v1696_v52, %v1696_v52  ;;  %v1701_v7 = vmul.f32 %v2663_v6, %v3380_v13 }
 0x1e4   : > { %v2667_v35 = vpop.eup %2666  ;;  %v1699_v19 = vmul.f32 %v2665_v15, %v3391_v20 }
 0x1e5   : > { %1857 = vst.msk [vmem:[%s3321_s6 + $0xa4] sm:$0xf] %vm1835_vm6, %v2313_v3  ;;  %v2318_v11 = vpack.c.bf16 %v1701_v7, %v1701_v7  ;;  %v1702_v39 = vmul.f32 %v2667_v35, %v3396_v48 }
 0x1e6   : > { %v2669_v45 = vpop.eup %2668  ;;  %v2316_v14 = vpack.c.bf16 %v1699_v19, %v1699_v19  ;;  %1910 = vrot.lane.b32.xlu1 %v2313_v3, %s2704_s7 }
 0x1e7   : > { %1862 = vst.msk [vmem:[%s3321_s6 + $0xd0] sm:$0xf] %vm1835_vm6, %v2318_v11  ;;  %v2319_v56 = vpack.c.bf16 %v1702_v39, %v1702_v39  ;;  %v1700_v26 = vmul.f32 %v2669_v45, %v3402_v43  ;;  %1920 = vrot.lane.b32.xlu0 %v2318_v11, %s2704_s7 }
 0x1e8   : > { %v2671_v13 = vpop.eup %2670  ;;  %1860 = vst.msk [vmem:[%s3321_s6 + $0xc0] sm:$0xf] %vm1835_vm6, %v2316_v14 }
 0x1e9   : > { %1863 = vst.msk [vmem:[%s3321_s6 + $0xd4] sm:$0xf] %vm1835_vm6, %v2319_v56  ;;  %v2317_v20 = vpack.c.bf16 %v1700_v26, %v1700_v26  ;;  %v1705_v48 = vmul.f32 %v2671_v13, %v3411_v10 }
 0x1ea   : > { %v2673_v61 = vpop.eup %2672  ;;  %1922 = vrot.lane.b32.xlu1 %v2319_v56, %s2704_s7 }
 0x1eb   : > { %1861 = vst.msk [vmem:[%s3321_s6 + $0xc4] sm:$0xf] %vm1835_vm6, %v2317_v20  ;;  %v2322_v9 = vpack.c.bf16 %v1705_v48, %v1705_v48  ;;  %v1703_v43 = vmul.f32 %v2673_v61, %v3418_v22  ;;  %1916 = vrot.lane.b32.xlu0 %v2316_v14, %s2704_s7 }
 0x1ec   : > { %v2675_v40 = vpop.eup %2674 }
 0x1ed   : > { %1866 = vst.msk [vmem:[%s3321_s6 + $0xf0] sm:$0xf] %vm1835_vm6, %v2322_v9  ;;  %v2320_v24 = vpack.c.bf16 %v1703_v43, %v1703_v43  ;;  %v1706_v8 = vmul.f32 %v2675_v40, %v3427_v57 }
 0x1ee   : > { %v2677_v10 = vpop.eup %2676  ;;  %1918 = vrot.lane.b32.xlu1 %v2317_v20, %s2704_s7 }
 0x1ef   : > { %1864 = vst.msk [vmem:[%s3321_s6 + $0xe0] sm:$0xf] %vm1835_vm6, %v2320_v24  ;;  %v2323_v18 = vpack.c.bf16 %v1706_v8, %v1706_v8  ;;  %v1704_v27 = vmul.f32 %v2677_v10, %v3433_v41  ;;  %1924 = vrot.lane.b32.xlu0 %v2320_v24, %s2704_s7 }
 0x1f1   : > { %1867 = vst.msk [vmem:[%s3321_s6 + $0xf4] sm:$0xf] %vm1835_vm6, %v2323_v18  ;;  %v2321_v22 = vpack.c.bf16 %v1704_v27, %v1704_v27 }
 0x1f3   : > { %1865 = vst.msk [vmem:[%s3321_s6 + $0xe4] sm:$0xf] %vm1835_vm6, %v2321_v22  ;;  %1928 = vrot.lane.b32.xlu0 %v2322_v9, %s2704_s7  ;;  %1926 = vrot.lane.b32.xlu1 %v2321_v22, %s2704_s7 }
 0x1f7   : > { %1930 = vrot.lane.b32.xlu1 %v2323_v18, %s2704_s7 }
 0x226   : > { %v1873_v57 = vpop.permute.xlu0 %1872 }
 0x227   : > { %2259 = vst.msk [vmem:[%s3321_s6 + $0x18] sm:$0xf] %vm1835_vm6, %v1873_v57 }
 0x22a   : > { %v1869_v41 = vpop.permute.xlu0 %1868  ;;  %v1875_v55 = vpop.permute.xlu1 %1874 }
 0x22b   : > { %2257 = vst.msk [vmem:[%s3321_s6 + $0x8] sm:$0xf] %vm1835_vm6, %v1869_v41  ;;  %2260 = vst.msk [vmem:[%s3321_s6 + $0x1c] sm:$0xf] %vm1835_vm6, %v1875_v55 }
 0x22e   : > { %v1881_v29 = vpop.permute.xlu0 %1880  ;;  %v1871_v21 = vpop.permute.xlu1 %1870 }
 0x22f   : > { %2263 = vst.msk [vmem:[%s3321_s6 + $0x38] sm:$0xf] %vm1835_vm6, %v1881_v29  ;;  %2258 = vst.msk [vmem:[%s3321_s6 + $0xc] sm:$0xf] %vm1835_vm6, %v1871_v21 }
 0x232   : > { %v1877_v36 = vpop.permute.xlu0 %1876  ;;  %v1883_v17 = vpop.permute.xlu1 %1882 }
 0x233   : > { %2261 = vst.msk [vmem:[%s3321_s6 + $0x28] sm:$0xf] %vm1835_vm6, %v1877_v36  ;;  %2264 = vst.msk [vmem:[%s3321_s6 + $0x3c] sm:$0xf] %vm1835_vm6, %v1883_v17 }
 0x236   : > { %v1879_v23 = vpop.permute.xlu1 %1878 }
 0x237   : > { %v1889_v31 = vpop.permute.xlu0 %1888  ;;  %2262 = vst.msk [vmem:[%s3321_s6 + $0x2c] sm:$0xf] %vm1835_vm6, %v1879_v23 }
 0x238   : > { %2267 = vst.msk [vmem:[%s3321_s6 + $0x58] sm:$0xf] %vm1835_vm6, %v1889_v31 }
 0x23b   : > { %v1885_v46 = vpop.permute.xlu0 %1884  ;;  %v1891_v30 = vpop.permute.xlu1 %1890 }
 0x23c   : > { %2265 = vst.msk [vmem:[%s3321_s6 + $0x48] sm:$0xf] %vm1835_vm6, %v1885_v46  ;;  %2268 = vst.msk [vmem:[%s3321_s6 + $0x5c] sm:$0xf] %vm1835_vm6, %v1891_v30 }
 0x23f   : > { %v1897_v54 = vpop.permute.xlu0 %1896  ;;  %v1887_v0 = vpop.permute.xlu1 %1886 }
 0x240   : > { %2271 = vst.msk [vmem:[%s3321_s6 + $0x78] sm:$0xf] %vm1835_vm6, %v1897_v54  ;;  %2266 = vst.msk [vmem:[%s3321_s6 + $0x4c] sm:$0xf] %vm1835_vm6, %v1887_v0 }
 0x243   : > { %v1893_v62 = vpop.permute.xlu0 %1892  ;;  %v1899_v2 = vpop.permute.xlu1 %1898 }
 0x244   : > { %2269 = vst.msk [vmem:[%s3321_s6 + $0x68] sm:$0xf] %vm1835_vm6, %v1893_v62  ;;  %2272 = vst.msk [vmem:[%s3321_s6 + $0x7c] sm:$0xf] %vm1835_vm6, %v1899_v2 }
 0x247   : > { %v1905_v32 = vpop.permute.xlu0 %1904  ;;  %v1895_v53 = vpop.permute.xlu1 %1894 }
 0x248   : > { %2275 = vst.msk [vmem:[%s3321_s6 + $0x98] sm:$0xf] %vm1835_vm6, %v1905_v32  ;;  %2270 = vst.msk [vmem:[%s3321_s6 + $0x6c] sm:$0xf] %vm1835_vm6, %v1895_v53 }
 0x24b   : > { %v1901_v34 = vpop.permute.xlu0 %1900 }
 0x24c   : > { %2273 = vst.msk [vmem:[%s3321_s6 + $0x88] sm:$0xf] %vm1835_vm6, %v1901_v34  ;;  %v1907_v51 = vpop.permute.xlu1 %1906 }
 0x24d   : > { %2276 = vst.msk [vmem:[%s3321_s6 + $0x9c] sm:$0xf] %vm1835_vm6, %v1907_v51 }
 0x250   : > { %v1913_v16 = vpop.permute.xlu0 %1912  ;;  %v1903_v49 = vpop.permute.xlu1 %1902 }
 0x251   : > { %2279 = vst.msk [vmem:[%s3321_s6 + $0xb8] sm:$0xf] %vm1835_vm6, %v1913_v16  ;;  %2274 = vst.msk [vmem:[%s3321_s6 + $0x8c] sm:$0xf] %vm1835_vm6, %v1903_v49 }
 0x254   : > { %v1909_v33 = vpop.permute.xlu0 %1908  ;;  %v1915_v58 = vpop.permute.xlu1 %1914 }
 0x255   : > { %2277 = vst.msk [vmem:[%s3321_s6 + $0xa8] sm:$0xf] %vm1835_vm6, %v1909_v33  ;;  %2280 = vst.msk [vmem:[%s3321_s6 + $0xbc] sm:$0xf] %vm1835_vm6, %v1915_v58 }
 0x258   : > { %v1911_v37 = vpop.permute.xlu1 %1910 }
 0x259   : > { %v1921_v28 = vpop.permute.xlu0 %1920  ;;  %2278 = vst.msk [vmem:[%s3321_s6 + $0xac] sm:$0xf] %vm1835_vm6, %v1911_v37 }
 0x25a   : > { %2283 = vst.msk [vmem:[%s3321_s6 + $0xd8] sm:$0xf] %vm1835_vm6, %v1921_v28 }
 0x25c   : > { %v1923_v60 = vpop.permute.xlu1 %1922 }
 0x25d   : > { %v1917_v44 = vpop.permute.xlu0 %1916  ;;  %2284 = vst.msk [vmem:[%s3321_s6 + $0xdc] sm:$0xf] %vm1835_vm6, %v1923_v60 }
 0x25e   : > { %2281 = vst.msk [vmem:[%s3321_s6 + $0xc8] sm:$0xf] %vm1835_vm6, %v1917_v44 }
 0x260   : > { %v1919_v50 = vpop.permute.xlu1 %1918 }
 0x261   : > { %2282 = vst.msk [vmem:[%s3321_s6 + $0xcc] sm:$0xf] %vm1835_vm6, %v1919_v50  ;;  %v1925_v1 = vpop.permute.xlu0 %1924 }
 0x262   : > { %2285 = vst.msk [vmem:[%s3321_s6 + $0xe8] sm:$0xf] %vm1835_vm6, %v1925_v1 }
 0x265   : > { %v1929_v59 = vpop.permute.xlu0 %1928  ;;  %v1927_v5 = vpop.permute.xlu1 %1926 }
 0x266   : > { %2287 = vst.msk [vmem:[%s3321_s6 + $0xf8] sm:$0xf] %vm1835_vm6, %v1929_v59  ;;  %2286 = vst.msk [vmem:[%s3321_s6 + $0xec] sm:$0xf] %vm1835_vm6, %v1927_v5 }
 0x269   : > { %v1931_v4 = vpop.permute.xlu1 %1930 }
 0x26a   : > { %2288 = vst.msk [vmem:[%s3321_s6 + $0xfc] sm:$0xf] %vm1835_vm6, %v1931_v4 }
 0x26b PF: > { %s13_s14 = sadd.s32 1, %s2700_s14   ;;  %s3592_s12 = smov %s2696_s13 }
 0x26c   : > { %p10_p5 = scmp.ge.s32.totalorder %s13_s14, 4   ;;  %s3593_s13 = smov %s3595_s15 }
 0x26e   :  { %12 = sbr.rel (!%p10_p5) target bundleno = 2 (0x2), region = 65 }

</bundles_post_ra>
